<compile_context>
chip_gen: v5e
topology: v5e:2x2
jax: 0.10.0
libtpu: 0.0.40
codegen_flags: <defaults>
</compile_context>

<pallas_src>
import jax
import jax.numpy as jnp
from jax.experimental import pallas as pl
from jax.experimental.pallas import tpu as pltpu

CNN_SETTINGS = [(32, 2), (40, 2), (64, 2), (80, 2), (160, 2)]
NUM_BLOCKS = len(CNN_SETTINGS)
FEAT_DIM = CNN_SETTINGS[-1][0]   # 160
FEAT_PAD = 256                   # lane-dense padded feature slab
LOGIT_PAD = 128                  # lane-dense padded logits slab (real logits: lanes 0..1)
SLAB_LANES = 256                 # lane width of both parameter slabs


# ----------------------------------------------------------------------------
# Fused whole-network kernel: 5 CNN blocks + AdaptiveAvgPool + Linear + ReLU,
# for ONE batch element per grid step.
# ----------------------------------------------------------------------------
def make_fused_kernel(c_in0, l0, layout):
    w_off = layout["w"]          # {(block, name): row offset} in the weight slab
    b_off = layout["b"]          # {(block, name): row offset} in the bias slab
    p_off = layout["p_even"]     # row offset of the (32, 64) even-row selector

    def kernel(x_ref, w_ref, b_ref, feat_ref, logit_ref):
        f32 = jnp.float32

        def mm(a, b):            # bf16 MXU matmul, f32 accumulation
            return jnp.dot(a.astype(jnp.bfloat16), b.astype(jnp.bfloat16),
                           preferred_element_type=f32)

        act = x_ref[...].astype(f32)                       # (l0, c_in0), channels on lanes
        l, c_in = l0, c_in0

        for i, (c_out, _red) in enumerate(CNN_SETTINGS):
            last = i == NUM_BLOCKS - 1
            out_lanes = FEAT_PAD if last else c_out

            # Static slab unpacking (free ref slices, 8-aligned row offsets).
            ow3p, ow3c, ow3n = w_off[(i, "w3p")], w_off[(i, "w3c")], w_off[(i, "w3n")]
            olca, ow1 = w_off[(i, "lca")], w_off[(i, "w1")]
            w3p = w_ref[ow3p:ow3p + c_in, 0:c_out]
            w3c = w_ref[ow3c:ow3c + c_in, 0:c_out]
            w3n = w_ref[ow3n:ow3n + c_in, 0:c_out]
            lca_wT = w_ref[olca:olca + c_out, 0:c_out]
            w1T = w_ref[ow1:ow1 + c_out, 0:out_lanes]
            ob3, olcb, ob1 = b_off[(i, "b3")], b_off[(i, "lca_b")], b_off[(i, "b1")]
            b3 = b_ref[ob3:ob3 + 1, 0:c_out]
            lca_b = b_ref[olcb:olcb + 1, 0:c_out]
            b1 = b_ref[ob1:ob1 + 1, 0:out_lanes]

            # --- ESPResidual_Block approx: Conv1d(k=3, pad=1) + BN(folded) + ReLU.
            # Shifts via XLU rolls; zero padding at the edges via (l,1) iota masks.
            row = jax.lax.broadcasted_iota(jnp.int32, (l, 1), 0)
            prev = pltpu.roll(act, 1, 0) * (row > 0).astype(f32)        # x[l-1]
            nxt = pltpu.roll(act, l - 1, 0) * (row < l - 1).astype(f32)  # x[l+1]
            y = mm(act, w3c) + mm(prev, w3p) + mm(nxt, w3n) + b3
            y = jnp.maximum(y, 0.0)                                      # (l, c_out)

            # --- MaxPool1d(2): pairwise max (VPU) with roll(-1) copy (XLU), then a
            # single tiny even-row selector matmul (row l-1 garbage never selected).
            y = jnp.maximum(y, pltpu.roll(y, l - 1, 0))
            lp = l // 2
            p_even = w_ref[p_off:p_off + lp, 0:l]                        # (lp, l) 0/1
            yp = mm(p_even, y)                                           # (lp, c_out)

            # --- LCA approx: SE-style channel attention (per batch element).
            gap = jnp.mean(yp, axis=0, keepdims=True)                    # (1, c_out)
            att = jax.nn.sigmoid(mm(gap, lca_wT) + lca_b)                # (1, c_out)
            ya = yp * att

            # --- Conv1d(k=1) + BatchNorm1d (both folded into w1T / b1).
            act = mm(ya, w1T) + b1                                       # (lp, out_lanes)
            l, c_in = lp, c_out

        # AdaptiveAvgPool1d(1) + Flatten (+ Dropout(0.1) = identity at inference).
        pooled = jnp.mean(act, axis=0, keepdims=True)                    # (1, FEAT_PAD)
        feat_ref[...] = pooled.astype(feat_ref.dtype)

        # Regression head: Linear + ReLU (the PyTorch head ends in nn.ReLU).
        ohw, ohb = w_off[(-1, "head_w")], b_off[(-1, "head_b")]
        hw = w_ref[ohw:ohw + FEAT_PAD, 0:LOGIT_PAD]
        hb = b_ref[ohb:ohb + 1, 0:LOGIT_PAD]
        logits = mm(pooled, hw) + hb
        logit_ref[...] = jnp.maximum(logits, 0.0).astype(logit_ref.dtype)

    return kernel


# ----------------------------------------------------------------------------
# Parameter construction (deterministic, synthetic), BN/bias folding, and
# host-side packing into two lane-padded slabs.
# ----------------------------------------------------------------------------
def _align_up(r, a):
    return (r + a - 1) // a * a


def _pack_slab(mats, lanes, dtype, align=8):
    """Stack 2-D matrices along rows into one (R, lanes) slab; each matrix's row
    start is aligned to `align` sublanes; unused lanes/rows are zero."""
    offs, r = [], 0
    for m in mats:
        r = _align_up(r, align)
        offs.append(r)
        r += m.shape[0]
    slab = jnp.zeros((_align_up(r, align), lanes), dtype)
    for m, o in zip(mats, offs):
        slab = slab.at[o:o + m.shape[0], :m.shape[1]].set(m.astype(dtype))
    return slab, offs


def _bn_fold(key, c):
    k1, k2, k3, k4 = jax.random.split(key, 4)
    gamma = 1.0 + 0.1 * jax.random.normal(k1, (c,))
    beta = 0.1 * jax.random.normal(k2, (c,))
    mean = 0.1 * jax.random.normal(k3, (c,))
    var = 1.0 + 0.1 * jnp.abs(jax.random.normal(k4, (c,)))
    scale = gamma / jnp.sqrt(var + 1e-5)
    shift = beta - mean * scale
    return scale, shift


def _make_block_params(key, c_in, c_out):
    ks = jax.random.split(key, 8)
    w3 = jax.random.normal(ks[0], (c_out, c_in, 3)) / jnp.sqrt(3.0 * c_in)
    b3 = 0.01 * jax.random.normal(ks[1], (c_out,))
    s1, t1 = _bn_fold(ks[2], c_out)
    w3 = w3 * s1[:, None, None]          # fold BN1 scale into conv3 weights
    b3 = s1 * b3 + t1                    # fold BN1 shift + conv3 bias

    lca_w = jax.random.normal(ks[3], (c_out, c_out)) / jnp.sqrt(1.0 * c_out)
    lca_b = 0.01 * jax.random.normal(ks[4], (c_out,))

    w1 = jax.random.normal(ks[5], (c_out, c_out)) / jnp.sqrt(1.0 * c_out)
    b1 = 0.01 * jax.random.normal(ks[6], (c_out,))
    s2, t2 = _bn_fold(ks[7], c_out)
    w1 = w1 * s2[:, None]                # fold BN2 scale into 1x1 conv weights
    b1 = s2 * b1 + t2                    # fold BN2 shift + 1x1 conv bias

    # Channel-on-lanes layout: weights pre-transposed so conv = act @ W.
    weights = dict(w3p=w3[:, :, 0].T, w3c=w3[:, :, 1].T, w3n=w3[:, :, 2].T,
                   lca=lca_w.T, w1=w1.T)
    biases = dict(b3=b3.reshape(1, -1), lca_b=lca_b.reshape(1, -1),
                  b1=b1.reshape(1, -1))
    return weights, biases


def make_params(key, c_in, l0):
    """Returns (arrays={'wslab','bslab'}, layout={'w','b','p_even'} with static ints)."""
    w_mats, w_keys, b_mats, b_keys = [], [], [], []
    c = c_in
    for i, (c_out, _red) in enumerate(CNN_SETTINGS):
        wd, bd = _make_block_params(jax.random.fold_in(key, i), c, c_out)
        for nm in ("w3p", "w3c", "w3n", "lca", "w1"):
            w_mats.append(wd[nm]); w_keys.append((i, nm))
        for nm in ("b3", "lca_b", "b1"):
            b_mats.append(bd[nm]); b_keys.append((i, nm))
        c = c_out

    # Regression head, lane-padded (rows 160..255 of head_wT are zero, matching
    # the zero-padded lanes of the pooled feature row).
    kh1, kh2 = jax.random.split(jax.random.fold_in(key, 100))
    head_w = jax.random.normal(kh1, (2, c)) / jnp.sqrt(1.0 * c)
    head_b = 0.01 * jax.random.normal(kh2, (2,))
    head_wT = jnp.zeros((FEAT_PAD, LOGIT_PAD)).at[:c, :2].set(head_w.T)
    head_bp = jnp.zeros((1, LOGIT_PAD)).at[0, :2].set(head_b)
    w_mats.append(head_wT); w_keys.append((-1, "head_w"))
    b_mats.append(head_bp); b_keys.append((-1, "head_b"))

    # MaxPool even-row selector: (l0/2, l0) with ones at (j, 2j). Every block's
    # selector is the nested top-left (l/2, l) sub-block of this single matrix.
    jj = jnp.arange(l0 // 2)[:, None]
    cc = jnp.arange(l0)[None, :]
    p_even = (cc == 2 * jj).astype(jnp.float32)
    w_mats.append(p_even); w_keys.append((-1, "p_even"))

    wslab, w_offs = _pack_slab(w_mats, SLAB_LANES, jnp.bfloat16, align=8)
    bslab, b_offs = _pack_slab(b_mats, SLAB_LANES, jnp.float32, align=8)

    layout = dict(
        w={k: o for k, o in zip(w_keys, w_offs)},
        b={k: o for k, o in zip(b_keys, b_offs)},
        p_even=dict(zip(w_keys, w_offs))[(-1, "p_even")],
    )
    return dict(wslab=wslab, bslab=bslab), layout


# ----------------------------------------------------------------------------
# Wrapper: one pallas_call, grid over the batch, parameters resident in VMEM.
# ----------------------------------------------------------------------------
def build_forward(layout):
    def forward(x, wslab, bslab):
        """Mirrors CNN_Only.forward: x (N, C_in, L) ->
        (regression_output (N, 2), cnn_output (N, feature_dim))."""
        n, c_in, l0 = x.shape
        xt = jnp.transpose(x, (0, 2, 1))               # (N, L, C): channels on lanes

        kernel = make_fused_kernel(c_in, l0, layout)
        feats, logits = pl.pallas_call(
            kernel,
            grid=(n,),
            in_specs=(
                pl.BlockSpec((None, l0, c_in), lambda b: (b, 0, 0)),
                pl.BlockSpec(wslab.shape, lambda b: (0, 0)),   # resident weights
                pl.BlockSpec(bslab.shape, lambda b: (0, 0)),   # resident biases
            ),
            out_specs=(
                pl.BlockSpec((None, 1, FEAT_PAD), lambda b: (b, 0, 0)),
                pl.BlockSpec((None, 1, LOGIT_PAD), lambda b: (b, 0, 0)),
            ),
            out_shape=(
                jax.ShapeDtypeStruct((n, 1, FEAT_PAD), jnp.float32),
                jax.ShapeDtypeStruct((n, 1, LOGIT_PAD), jnp.float32),
            ),
            compiler_params=pltpu.CompilerParams(
                dimension_semantics=("parallel",)),
        )(xt, wslab, bslab)

        return logits[:, 0, :2], feats[:, 0, :FEAT_DIM]

    return forward


# ----------------------------------------------------------------------------
if __name__ == "__main__":
    NUM_SIGNALS = 4      # len(SIGNALS_LIST)
    SIGNAL_LENGTH = 64   # INPUT_LENGTH
    BATCH = 2

    key = jax.random.PRNGKey(0)
    kx, kp = jax.random.split(key)
    x_signals = jax.random.normal(kx, (BATCH, NUM_SIGNALS, SIGNAL_LENGTH),
                                  jnp.float32)
    arrays, layout = make_params(kp, NUM_SIGNALS, SIGNAL_LENGTH)

    fwd = jax.jit(build_forward(layout))
    logits, feats = fwd(x_signals, arrays["wslab"], arrays["bslab"])
    jax.block_until_ready((logits, feats))

    assert logits.shape == (BATCH, 2)
    assert feats.shape == (BATCH, FEAT_DIM)           # feature_dim = 160
    assert bool(jnp.all(jnp.isfinite(logits)))
    assert bool(jnp.all(jnp.isfinite(feats)))
    assert bool(jnp.all(logits >= 0.0))               # head ends in ReLU
    print("KERNEL_OK")
</pallas_src>

<mosaic_0001>
module attributes {stable_mosaic.version = 11 : i64} {
  func.func @kernel(%arg0: i32, %arg1: memref<1x64x4xf32, #tpu.memory_space<vmem>>, %arg2: memref<1712x256xbf16, #tpu.memory_space<vmem>>, %arg3: memref<128x256xf32, #tpu.memory_space<vmem>>, %arg4: memref<1x1x256xf32, #tpu.memory_space<vmem>>, %arg5: memref<1x1x128xf32, #tpu.memory_space<vmem>>) attributes {dimension_semantics = [#tpu.dimension_semantics<parallel>], iteration_bounds = array<i64: 2>, scalar_prefetch = 0 : i64, scratch_operands = 0 : i64, tpu.core_type = #tpu.core_type<tc>, window_params = [{transform_indices = @transform_0, window_bounds = array<i64: 1, 64, 4>}, {pipeline_mode = #tpu.pipeline_mode<synchronous>, transform_indices = @transform_1, window_bounds = array<i64: 1712, 256>}, {pipeline_mode = #tpu.pipeline_mode<synchronous>, transform_indices = @transform_2, window_bounds = array<i64: 128, 256>}, {transform_indices = @transform_3, window_bounds = array<i64: 1, 1, 256>}, {transform_indices = @transform_4, window_bounds = array<i64: 1, 1, 128>}]} {
    %c0 = arith.constant 0 : index
    %c0_0 = arith.constant 0 : index
    %c0_1 = arith.constant 0 : index
    %0 = vector.load %arg1[%c0, %c0_0, %c0_1] : memref<1x64x4xf32, #tpu.memory_space<vmem>>, vector<1x64x4xf32>
    %1 = vector.shape_cast %0 : vector<1x64x4xf32> to vector<64x4xf32>
    %c0_2 = arith.constant 0 : index
    %c0_3 = arith.constant 0 : index
    %2 = vector.load %arg2[%c0_2, %c0_3] : memref<1712x256xbf16, #tpu.memory_space<vmem>>, vector<4x32xbf16>
    %c8 = arith.constant 8 : index
    %c0_4 = arith.constant 0 : index
    %3 = vector.load %arg2[%c8, %c0_4] : memref<1712x256xbf16, #tpu.memory_space<vmem>>, vector<4x32xbf16>
    %c16 = arith.constant 16 : index
    %c0_5 = arith.constant 0 : index
    %4 = vector.load %arg2[%c16, %c0_5] : memref<1712x256xbf16, #tpu.memory_space<vmem>>, vector<4x32xbf16>
    %c24 = arith.constant 24 : index
    %c0_6 = arith.constant 0 : index
    %5 = vector.load %arg2[%c24, %c0_6] : memref<1712x256xbf16, #tpu.memory_space<vmem>>, vector<32x32xbf16>
    %c56 = arith.constant 56 : index
    %c0_7 = arith.constant 0 : index
    %6 = vector.load %arg2[%c56, %c0_7] : memref<1712x256xbf16, #tpu.memory_space<vmem>>, vector<32x32xbf16>
    %c0_8 = arith.constant 0 : index
    %c0_9 = arith.constant 0 : index
    %7 = vector.load %arg3[%c0_8, %c0_9] : memref<128x256xf32, #tpu.memory_space<vmem>>, vector<1x32xf32>
    %c8_10 = arith.constant 8 : index
    %c0_11 = arith.constant 0 : index
    %8 = vector.load %arg3[%c8_10, %c0_11] : memref<128x256xf32, #tpu.memory_space<vmem>>, vector<1x32xf32>
    %c16_12 = arith.constant 16 : index
    %c0_13 = arith.constant 0 : index
    %9 = vector.load %arg3[%c16_12, %c0_13] : memref<128x256xf32, #tpu.memory_space<vmem>>, vector<1x32xf32>
    %10 = tpu.iota {dimensions = array<i32: 0>} : vector<64x1xi32>
    %c1_i32 = arith.constant 1 : i32
    %11 = tpu.dynamic_rotate %1 by %c1_i32 dim 0 : vector<64x4xf32>, i32 -> vector<64x4xf32>
    %c0_i32 = arith.constant 0 : i32
    %12 = vector.broadcast %c0_i32 : i32 to vector<64x1xi32>
    %13 = arith.cmpi sgt, %10, %12 : vector<64x1xi32>
    %14 = arith.extui %13 : vector<64x1xi1> to vector<64x1xi32>
    %15 = arith.sitofp %14 : vector<64x1xi32> to vector<64x1xf32>
    %16 = vector.broadcast %15 : vector<64x1xf32> to vector<64x4xf32>
    %17 = arith.mulf %11, %16 : vector<64x4xf32>
    %c63_i32 = arith.constant 63 : i32
    %18 = tpu.dynamic_rotate %1 by %c63_i32 dim 0 : vector<64x4xf32>, i32 -> vector<64x4xf32>
    %c63_i32_14 = arith.constant 63 : i32
    %19 = vector.broadcast %c63_i32_14 : i32 to vector<64x1xi32>
    %20 = arith.cmpi slt, %10, %19 : vector<64x1xi32>
    %21 = arith.extui %20 : vector<64x1xi1> to vector<64x1xi32>
    %22 = arith.sitofp %21 : vector<64x1xi32> to vector<64x1xf32>
    %23 = vector.broadcast %22 : vector<64x1xf32> to vector<64x4xf32>
    %24 = arith.mulf %18, %23 : vector<64x4xf32>
    %25 = arith.truncf %1 : vector<64x4xf32> to vector<64x4xbf16>
    %cst = arith.constant dense<0.000000e+00> : vector<64x32xf32>
    %26 = tpu.matmul %25, %3, %cst {dimension_numbers = #tpu.dot_dimension_numbers<[1], [0], [0], [1], [0, 0, 1, 1], [], []>} : vector<64x4xbf16>, vector<4x32xbf16>, vector<64x32xf32> -> vector<64x32xf32>
    %27 = arith.truncf %17 : vector<64x4xf32> to vector<64x4xbf16>
    %cst_15 = arith.constant dense<0.000000e+00> : vector<64x32xf32>
    %28 = tpu.matmul %27, %2, %cst_15 {dimension_numbers = #tpu.dot_dimension_numbers<[1], [0], [0], [1], [0, 0, 1, 1], [], []>} : vector<64x4xbf16>, vector<4x32xbf16>, vector<64x32xf32> -> vector<64x32xf32>
    %29 = arith.addf %26, %28 : vector<64x32xf32>
    %30 = arith.truncf %24 : vector<64x4xf32> to vector<64x4xbf16>
    %cst_16 = arith.constant dense<0.000000e+00> : vector<64x32xf32>
    %31 = tpu.matmul %30, %4, %cst_16 {dimension_numbers = #tpu.dot_dimension_numbers<[1], [0], [0], [1], [0, 0, 1, 1], [], []>} : vector<64x4xbf16>, vector<4x32xbf16>, vector<64x32xf32> -> vector<64x32xf32>
    %32 = arith.addf %29, %31 : vector<64x32xf32>
    %33 = vector.broadcast %7 : vector<1x32xf32> to vector<64x32xf32>
    %34 = arith.addf %32, %33 : vector<64x32xf32>
    %cst_17 = arith.constant 0.000000e+00 : f32
    %35 = vector.broadcast %cst_17 : f32 to vector<64x32xf32>
    %36 = arith.maximumf %34, %35 : vector<64x32xf32>
    %c63_i32_18 = arith.constant 63 : i32
    %37 = tpu.dynamic_rotate %36 by %c63_i32_18 dim 0 : vector<64x32xf32>, i32 -> vector<64x32xf32>
    %38 = arith.maximumf %36, %37 : vector<64x32xf32>
    %c1680 = arith.constant 1680 : index
    %c0_19 = arith.constant 0 : index
    %39 = vector.load %arg2[%c1680, %c0_19] : memref<1712x256xbf16, #tpu.memory_space<vmem>>, vector<32x64xbf16>
    %40 = arith.truncf %38 : vector<64x32xf32> to vector<64x32xbf16>
    %cst_20 = arith.constant dense<0.000000e+00> : vector<32x32xf32>
    %41 = tpu.matmul %39, %40, %cst_20 {dimension_numbers = #tpu.dot_dimension_numbers<[1], [0], [0], [1], [0, 0, 1, 1], [], []>} : vector<32x64xbf16>, vector<64x32xbf16>, vector<32x32xf32> -> vector<32x32xf32>
    %cst_21 = arith.constant dense<0.000000e+00> : vector<32xf32>
    %42 = vector.multi_reduction <add>, %41, %cst_21 [0] : vector<32x32xf32> to vector<32xf32>
    %43 = vector.shape_cast %42 : vector<32xf32> to vector<1x32xf32>
    %cst_22 = arith.constant 3.200000e+01 : f32
    %44 = vector.broadcast %cst_22 : f32 to vector<1x32xf32>
    %45 = arith.divf %43, %44 : vector<1x32xf32>
    %46 = arith.truncf %45 : vector<1x32xf32> to vector<1x32xbf16>
    %cst_23 = arith.constant dense<0.000000e+00> : vector<1x32xf32>
    %47 = tpu.matmul %46, %5, %cst_23 {dimension_numbers = #tpu.dot_dimension_numbers<[1], [0], [0], [1], [0, 0, 1, 1], [], []>} : vector<1x32xbf16>, vector<32x32xbf16>, vector<1x32xf32> -> vector<1x32xf32>
    %48 = arith.addf %47, %8 : vector<1x32xf32>
    %49 = arith.negf %48 : vector<1x32xf32>
    %50 = math.exp %49 : vector<1x32xf32>
    %cst_24 = arith.constant 1.000000e+00 : f32
    %51 = vector.broadcast %cst_24 : f32 to vector<1x32xf32>
    %52 = arith.addf %51, %50 : vector<1x32xf32>
    %53 = arith.divf %51, %52 : vector<1x32xf32>
    %54 = vector.broadcast %53 : vector<1x32xf32> to vector<32x32xf32>
    %55 = arith.mulf %41, %54 : vector<32x32xf32>
    %56 = arith.truncf %55 : vector<32x32xf32> to vector<32x32xbf16>
    %cst_25 = arith.constant dense<0.000000e+00> : vector<32x32xf32>
    %57 = tpu.matmul %56, %6, %cst_25 {dimension_numbers = #tpu.dot_dimension_numbers<[1], [0], [0], [1], [0, 0, 1, 1], [], []>} : vector<32x32xbf16>, vector<32x32xbf16>, vector<32x32xf32> -> vector<32x32xf32>
    %58 = vector.broadcast %9 : vector<1x32xf32> to vector<32x32xf32>
    %59 = arith.addf %57, %58 : vector<32x32xf32>
    %c88 = arith.constant 88 : index
    %c0_26 = arith.constant 0 : index
    %60 = vector.load %arg2[%c88, %c0_26] : memref<1712x256xbf16, #tpu.memory_space<vmem>>, vector<32x40xbf16>
    %c120 = arith.constant 120 : index
    %c0_27 = arith.constant 0 : index
    %61 = vector.load %arg2[%c120, %c0_27] : memref<1712x256xbf16, #tpu.memory_space<vmem>>, vector<32x40xbf16>
    %c152 = arith.constant 152 : index
    %c0_28 = arith.constant 0 : index
    %62 = vector.load %arg2[%c152, %c0_28] : memref<1712x256xbf16, #tpu.memory_space<vmem>>, vector<32x40xbf16>
    %c184 = arith.constant 184 : index
    %c0_29 = arith.constant 0 : index
    %63 = vector.load %arg2[%c184, %c0_29] : memref<1712x256xbf16, #tpu.memory_space<vmem>>, vector<40x40xbf16>
    %c224 = arith.constant 224 : index
    %c0_30 = arith.constant 0 : index
    %64 = vector.load %arg2[%c224, %c0_30] : memref<1712x256xbf16, #tpu.memory_space<vmem>>, vector<40x40xbf16>
    %c24_31 = arith.constant 24 : index
    %c0_32 = arith.constant 0 : index
    %65 = vector.load %arg3[%c24_31, %c0_32] : memref<128x256xf32, #tpu.memory_space<vmem>>, vector<1x40xf32>
    %c32 = arith.constant 32 : index
    %c0_33 = arith.constant 0 : index
    %66 = vector.load %arg3[%c32, %c0_33] : memref<128x256xf32, #tpu.memory_space<vmem>>, vector<1x40xf32>
    %c40 = arith.constant 40 : index
    %c0_34 = arith.constant 0 : index
    %67 = vector.load %arg3[%c40, %c0_34] : memref<128x256xf32, #tpu.memory_space<vmem>>, vector<1x40xf32>
    %68 = tpu.iota {dimensions = array<i32: 0>} : vector<32x1xi32>
    %c1_i32_35 = arith.constant 1 : i32
    %69 = tpu.dynamic_rotate %59 by %c1_i32_35 dim 0 : vector<32x32xf32>, i32 -> vector<32x32xf32>
    %c0_i32_36 = arith.constant 0 : i32
    %70 = vector.broadcast %c0_i32_36 : i32 to vector<32x1xi32>
    %71 = arith.cmpi sgt, %68, %70 : vector<32x1xi32>
    %72 = arith.extui %71 : vector<32x1xi1> to vector<32x1xi32>
    %73 = arith.sitofp %72 : vector<32x1xi32> to vector<32x1xf32>
    %74 = vector.broadcast %73 : vector<32x1xf32> to vector<32x32xf32>
    %75 = arith.mulf %69, %74 : vector<32x32xf32>
    %c31_i32 = arith.constant 31 : i32
    %76 = tpu.dynamic_rotate %59 by %c31_i32 dim 0 : vector<32x32xf32>, i32 -> vector<32x32xf32>
    %c31_i32_37 = arith.constant 31 : i32
    %77 = vector.broadcast %c31_i32_37 : i32 to vector<32x1xi32>
    %78 = arith.cmpi slt, %68, %77 : vector<32x1xi32>
    %79 = arith.extui %78 : vector<32x1xi1> to vector<32x1xi32>
    %80 = arith.sitofp %79 : vector<32x1xi32> to vector<32x1xf32>
    %81 = vector.broadcast %80 : vector<32x1xf32> to vector<32x32xf32>
    %82 = arith.mulf %76, %81 : vector<32x32xf32>
    %83 = arith.truncf %59 : vector<32x32xf32> to vector<32x32xbf16>
    %cst_38 = arith.constant dense<0.000000e+00> : vector<32x40xf32>
    %84 = tpu.matmul %83, %61, %cst_38 {dimension_numbers = #tpu.dot_dimension_numbers<[1], [0], [0], [1], [0, 0, 1, 1], [], []>} : vector<32x32xbf16>, vector<32x40xbf16>, vector<32x40xf32> -> vector<32x40xf32>
    %85 = arith.truncf %75 : vector<32x32xf32> to vector<32x32xbf16>
    %cst_39 = arith.constant dense<0.000000e+00> : vector<32x40xf32>
    %86 = tpu.matmul %85, %60, %cst_39 {dimension_numbers = #tpu.dot_dimension_numbers<[1], [0], [0], [1], [0, 0, 1, 1], [], []>} : vector<32x32xbf16>, vector<32x40xbf16>, vector<32x40xf32> -> vector<32x40xf32>
    %87 = arith.addf %84, %86 : vector<32x40xf32>
    %88 = arith.truncf %82 : vector<32x32xf32> to vector<32x32xbf16>
    %cst_40 = arith.constant dense<0.000000e+00> : vector<32x40xf32>
    %89 = tpu.matmul %88, %62, %cst_40 {dimension_numbers = #tpu.dot_dimension_numbers<[1], [0], [0], [1], [0, 0, 1, 1], [], []>} : vector<32x32xbf16>, vector<32x40xbf16>, vector<32x40xf32> -> vector<32x40xf32>
    %90 = arith.addf %87, %89 : vector<32x40xf32>
    %91 = vector.broadcast %65 : vector<1x40xf32> to vector<32x40xf32>
    %92 = arith.addf %90, %91 : vector<32x40xf32>
    %cst_41 = arith.constant 0.000000e+00 : f32
    %93 = vector.broadcast %cst_41 : f32 to vector<32x40xf32>
    %94 = arith.maximumf %92, %93 : vector<32x40xf32>
    %c31_i32_42 = arith.constant 31 : i32
    %95 = tpu.dynamic_rotate %94 by %c31_i32_42 dim 0 : vector<32x40xf32>, i32 -> vector<32x40xf32>
    %96 = arith.maximumf %94, %95 : vector<32x40xf32>
    %c1680_43 = arith.constant 1680 : index
    %c0_44 = arith.constant 0 : index
    %97 = vector.load %arg2[%c1680_43, %c0_44] : memref<1712x256xbf16, #tpu.memory_space<vmem>>, vector<16x32xbf16>
    %98 = arith.truncf %96 : vector<32x40xf32> to vector<32x40xbf16>
    %cst_45 = arith.constant dense<0.000000e+00> : vector<16x40xf32>
    %99 = tpu.matmul %97, %98, %cst_45 {dimension_numbers = #tpu.dot_dimension_numbers<[1], [0], [0], [1], [0, 0, 1, 1], [], []>} : vector<16x32xbf16>, vector<32x40xbf16>, vector<16x40xf32> -> vector<16x40xf32>
    %cst_46 = arith.constant dense<0.000000e+00> : vector<40xf32>
    %100 = vector.multi_reduction <add>, %99, %cst_46 [0] : vector<16x40xf32> to vector<40xf32>
    %101 = vector.shape_cast %100 : vector<40xf32> to vector<1x40xf32>
    %cst_47 = arith.constant 1.600000e+01 : f32
    %102 = vector.broadcast %cst_47 : f32 to vector<1x40xf32>
    %103 = arith.divf %101, %102 : vector<1x40xf32>
    %104 = arith.truncf %103 : vector<1x40xf32> to vector<1x40xbf16>
    %cst_48 = arith.constant dense<0.000000e+00> : vector<1x40xf32>
    %105 = tpu.matmul %104, %63, %cst_48 {dimension_numbers = #tpu.dot_dimension_numbers<[1], [0], [0], [1], [0, 0, 1, 1], [], []>} : vector<1x40xbf16>, vector<40x40xbf16>, vector<1x40xf32> -> vector<1x40xf32>
    %106 = arith.addf %105, %66 : vector<1x40xf32>
    %107 = arith.negf %106 : vector<1x40xf32>
    %108 = math.exp %107 : vector<1x40xf32>
    %cst_49 = arith.constant 1.000000e+00 : f32
    %109 = vector.broadcast %cst_49 : f32 to vector<1x40xf32>
    %110 = arith.addf %109, %108 : vector<1x40xf32>
    %111 = arith.divf %109, %110 : vector<1x40xf32>
    %112 = vector.broadcast %111 : vector<1x40xf32> to vector<16x40xf32>
    %113 = arith.mulf %99, %112 : vector<16x40xf32>
    %114 = arith.truncf %113 : vector<16x40xf32> to vector<16x40xbf16>
    %cst_50 = arith.constant dense<0.000000e+00> : vector<16x40xf32>
    %115 = tpu.matmul %114, %64, %cst_50 {dimension_numbers = #tpu.dot_dimension_numbers<[1], [0], [0], [1], [0, 0, 1, 1], [], []>} : vector<16x40xbf16>, vector<40x40xbf16>, vector<16x40xf32> -> vector<16x40xf32>
    %116 = vector.broadcast %67 : vector<1x40xf32> to vector<16x40xf32>
    %117 = arith.addf %115, %116 : vector<16x40xf32>
    %c264 = arith.constant 264 : index
    %c0_51 = arith.constant 0 : index
    %118 = vector.load %arg2[%c264, %c0_51] : memref<1712x256xbf16, #tpu.memory_space<vmem>>, vector<40x64xbf16>
    %c304 = arith.constant 304 : index
    %c0_52 = arith.constant 0 : index
    %119 = vector.load %arg2[%c304, %c0_52] : memref<1712x256xbf16, #tpu.memory_space<vmem>>, vector<40x64xbf16>
    %c344 = arith.constant 344 : index
    %c0_53 = arith.constant 0 : index
    %120 = vector.load %arg2[%c344, %c0_53] : memref<1712x256xbf16, #tpu.memory_space<vmem>>, vector<40x64xbf16>
    %c384 = arith.constant 384 : index
    %c0_54 = arith.constant 0 : index
    %121 = vector.load %arg2[%c384, %c0_54] : memref<1712x256xbf16, #tpu.memory_space<vmem>>, vector<64x64xbf16>
    %c448 = arith.constant 448 : index
    %c0_55 = arith.constant 0 : index
    %122 = vector.load %arg2[%c448, %c0_55] : memref<1712x256xbf16, #tpu.memory_space<vmem>>, vector<64x64xbf16>
    %c48 = arith.constant 48 : index
    %c0_56 = arith.constant 0 : index
    %123 = vector.load %arg3[%c48, %c0_56] : memref<128x256xf32, #tpu.memory_space<vmem>>, vector<1x64xf32>
    %c56_57 = arith.constant 56 : index
    %c0_58 = arith.constant 0 : index
    %124 = vector.load %arg3[%c56_57, %c0_58] : memref<128x256xf32, #tpu.memory_space<vmem>>, vector<1x64xf32>
    %c64 = arith.constant 64 : index
    %c0_59 = arith.constant 0 : index
    %125 = vector.load %arg3[%c64, %c0_59] : memref<128x256xf32, #tpu.memory_space<vmem>>, vector<1x64xf32>
    %126 = tpu.iota {dimensions = array<i32: 0>} : vector<16x1xi32>
    %c1_i32_60 = arith.constant 1 : i32
    %127 = tpu.dynamic_rotate %117 by %c1_i32_60 dim 0 : vector<16x40xf32>, i32 -> vector<16x40xf32>
    %c0_i32_61 = arith.constant 0 : i32
    %128 = vector.broadcast %c0_i32_61 : i32 to vector<16x1xi32>
    %129 = arith.cmpi sgt, %126, %128 : vector<16x1xi32>
    %130 = arith.extui %129 : vector<16x1xi1> to vector<16x1xi32>
    %131 = arith.sitofp %130 : vector<16x1xi32> to vector<16x1xf32>
    %132 = vector.broadcast %131 : vector<16x1xf32> to vector<16x40xf32>
    %133 = arith.mulf %127, %132 : vector<16x40xf32>
    %c15_i32 = arith.constant 15 : i32
    %134 = tpu.dynamic_rotate %117 by %c15_i32 dim 0 : vector<16x40xf32>, i32 -> vector<16x40xf32>
    %c15_i32_62 = arith.constant 15 : i32
    %135 = vector.broadcast %c15_i32_62 : i32 to vector<16x1xi32>
    %136 = arith.cmpi slt, %126, %135 : vector<16x1xi32>
    %137 = arith.extui %136 : vector<16x1xi1> to vector<16x1xi32>
    %138 = arith.sitofp %137 : vector<16x1xi32> to vector<16x1xf32>
    %139 = vector.broadcast %138 : vector<16x1xf32> to vector<16x40xf32>
    %140 = arith.mulf %134, %139 : vector<16x40xf32>
    %141 = arith.truncf %117 : vector<16x40xf32> to vector<16x40xbf16>
    %cst_63 = arith.constant dense<0.000000e+00> : vector<16x64xf32>
    %142 = tpu.matmul %141, %119, %cst_63 {dimension_numbers = #tpu.dot_dimension_numbers<[1], [0], [0], [1], [0, 0, 1, 1], [], []>} : vector<16x40xbf16>, vector<40x64xbf16>, vector<16x64xf32> -> vector<16x64xf32>
    %143 = arith.truncf %133 : vector<16x40xf32> to vector<16x40xbf16>
    %cst_64 = arith.constant dense<0.000000e+00> : vector<16x64xf32>
    %144 = tpu.matmul %143, %118, %cst_64 {dimension_numbers = #tpu.dot_dimension_numbers<[1], [0], [0], [1], [0, 0, 1, 1], [], []>} : vector<16x40xbf16>, vector<40x64xbf16>, vector<16x64xf32> -> vector<16x64xf32>
    %145 = arith.addf %142, %144 : vector<16x64xf32>
    %146 = arith.truncf %140 : vector<16x40xf32> to vector<16x40xbf16>
    %cst_65 = arith.constant dense<0.000000e+00> : vector<16x64xf32>
    %147 = tpu.matmul %146, %120, %cst_65 {dimension_numbers = #tpu.dot_dimension_numbers<[1], [0], [0], [1], [0, 0, 1, 1], [], []>} : vector<16x40xbf16>, vector<40x64xbf16>, vector<16x64xf32> -> vector<16x64xf32>
    %148 = arith.addf %145, %147 : vector<16x64xf32>
    %149 = vector.broadcast %123 : vector<1x64xf32> to vector<16x64xf32>
    %150 = arith.addf %148, %149 : vector<16x64xf32>
    %cst_66 = arith.constant 0.000000e+00 : f32
    %151 = vector.broadcast %cst_66 : f32 to vector<16x64xf32>
    %152 = arith.maximumf %150, %151 : vector<16x64xf32>
    %c15_i32_67 = arith.constant 15 : i32
    %153 = tpu.dynamic_rotate %152 by %c15_i32_67 dim 0 : vector<16x64xf32>, i32 -> vector<16x64xf32>
    %154 = arith.maximumf %152, %153 : vector<16x64xf32>
    %c1680_68 = arith.constant 1680 : index
    %c0_69 = arith.constant 0 : index
    %155 = vector.load %arg2[%c1680_68, %c0_69] : memref<1712x256xbf16, #tpu.memory_space<vmem>>, vector<8x16xbf16>
    %156 = arith.truncf %154 : vector<16x64xf32> to vector<16x64xbf16>
    %cst_70 = arith.constant dense<0.000000e+00> : vector<8x64xf32>
    %157 = tpu.matmul %155, %156, %cst_70 {dimension_numbers = #tpu.dot_dimension_numbers<[1], [0], [0], [1], [0, 0, 1, 1], [], []>} : vector<8x16xbf16>, vector<16x64xbf16>, vector<8x64xf32> -> vector<8x64xf32>
    %cst_71 = arith.constant dense<0.000000e+00> : vector<64xf32>
    %158 = vector.multi_reduction <add>, %157, %cst_71 [0] : vector<8x64xf32> to vector<64xf32>
    %159 = vector.shape_cast %158 : vector<64xf32> to vector<1x64xf32>
    %cst_72 = arith.constant 8.000000e+00 : f32
    %160 = vector.broadcast %cst_72 : f32 to vector<1x64xf32>
    %161 = arith.divf %159, %160 : vector<1x64xf32>
    %162 = arith.truncf %161 : vector<1x64xf32> to vector<1x64xbf16>
    %cst_73 = arith.constant dense<0.000000e+00> : vector<1x64xf32>
    %163 = tpu.matmul %162, %121, %cst_73 {dimension_numbers = #tpu.dot_dimension_numbers<[1], [0], [0], [1], [0, 0, 1, 1], [], []>} : vector<1x64xbf16>, vector<64x64xbf16>, vector<1x64xf32> -> vector<1x64xf32>
    %164 = arith.addf %163, %124 : vector<1x64xf32>
    %165 = arith.negf %164 : vector<1x64xf32>
    %166 = math.exp %165 : vector<1x64xf32>
    %cst_74 = arith.constant 1.000000e+00 : f32
    %167 = vector.broadcast %cst_74 : f32 to vector<1x64xf32>
    %168 = arith.addf %167, %166 : vector<1x64xf32>
    %169 = arith.divf %167, %168 : vector<1x64xf32>
    %170 = vector.broadcast %169 : vector<1x64xf32> to vector<8x64xf32>
    %171 = arith.mulf %157, %170 : vector<8x64xf32>
    %172 = arith.truncf %171 : vector<8x64xf32> to vector<8x64xbf16>
    %cst_75 = arith.constant dense<0.000000e+00> : vector<8x64xf32>
    %173 = tpu.matmul %172, %122, %cst_75 {dimension_numbers = #tpu.dot_dimension_numbers<[1], [0], [0], [1], [0, 0, 1, 1], [], []>} : vector<8x64xbf16>, vector<64x64xbf16>, vector<8x64xf32> -> vector<8x64xf32>
    %174 = vector.broadcast %125 : vector<1x64xf32> to vector<8x64xf32>
    %175 = arith.addf %173, %174 : vector<8x64xf32>
    %c512 = arith.constant 512 : index
    %c0_76 = arith.constant 0 : index
    %176 = vector.load %arg2[%c512, %c0_76] : memref<1712x256xbf16, #tpu.memory_space<vmem>>, vector<64x80xbf16>
    %c576 = arith.constant 576 : index
    %c0_77 = arith.constant 0 : index
    %177 = vector.load %arg2[%c576, %c0_77] : memref<1712x256xbf16, #tpu.memory_space<vmem>>, vector<64x80xbf16>
    %c640 = arith.constant 640 : index
    %c0_78 = arith.constant 0 : index
    %178 = vector.load %arg2[%c640, %c0_78] : memref<1712x256xbf16, #tpu.memory_space<vmem>>, vector<64x80xbf16>
    %c704 = arith.constant 704 : index
    %c0_79 = arith.constant 0 : index
    %179 = vector.load %arg2[%c704, %c0_79] : memref<1712x256xbf16, #tpu.memory_space<vmem>>, vector<80x80xbf16>
    %c784 = arith.constant 784 : index
    %c0_80 = arith.constant 0 : index
    %180 = vector.load %arg2[%c784, %c0_80] : memref<1712x256xbf16, #tpu.memory_space<vmem>>, vector<80x80xbf16>
    %c72 = arith.constant 72 : index
    %c0_81 = arith.constant 0 : index
    %181 = vector.load %arg3[%c72, %c0_81] : memref<128x256xf32, #tpu.memory_space<vmem>>, vector<1x80xf32>
    %c80 = arith.constant 80 : index
    %c0_82 = arith.constant 0 : index
    %182 = vector.load %arg3[%c80, %c0_82] : memref<128x256xf32, #tpu.memory_space<vmem>>, vector<1x80xf32>
    %c88_83 = arith.constant 88 : index
    %c0_84 = arith.constant 0 : index
    %183 = vector.load %arg3[%c88_83, %c0_84] : memref<128x256xf32, #tpu.memory_space<vmem>>, vector<1x80xf32>
    %184 = tpu.iota {dimensions = array<i32: 0>} : vector<8x1xi32>
    %c1_i32_85 = arith.constant 1 : i32
    %185 = tpu.dynamic_rotate %175 by %c1_i32_85 dim 0 : vector<8x64xf32>, i32 -> vector<8x64xf32>
    %c0_i32_86 = arith.constant 0 : i32
    %186 = vector.broadcast %c0_i32_86 : i32 to vector<8x1xi32>
    %187 = arith.cmpi sgt, %184, %186 : vector<8x1xi32>
    %188 = arith.extui %187 : vector<8x1xi1> to vector<8x1xi32>
    %189 = arith.sitofp %188 : vector<8x1xi32> to vector<8x1xf32>
    %190 = vector.broadcast %189 : vector<8x1xf32> to vector<8x64xf32>
    %191 = arith.mulf %185, %190 : vector<8x64xf32>
    %c7_i32 = arith.constant 7 : i32
    %192 = tpu.dynamic_rotate %175 by %c7_i32 dim 0 : vector<8x64xf32>, i32 -> vector<8x64xf32>
    %c7_i32_87 = arith.constant 7 : i32
    %193 = vector.broadcast %c7_i32_87 : i32 to vector<8x1xi32>
    %194 = arith.cmpi slt, %184, %193 : vector<8x1xi32>
    %195 = arith.extui %194 : vector<8x1xi1> to vector<8x1xi32>
    %196 = arith.sitofp %195 : vector<8x1xi32> to vector<8x1xf32>
    %197 = vector.broadcast %196 : vector<8x1xf32> to vector<8x64xf32>
    %198 = arith.mulf %192, %197 : vector<8x64xf32>
    %199 = arith.truncf %175 : vector<8x64xf32> to vector<8x64xbf16>
    %cst_88 = arith.constant dense<0.000000e+00> : vector<8x80xf32>
    %200 = tpu.matmul %199, %177, %cst_88 {dimension_numbers = #tpu.dot_dimension_numbers<[1], [0], [0], [1], [0, 0, 1, 1], [], []>} : vector<8x64xbf16>, vector<64x80xbf16>, vector<8x80xf32> -> vector<8x80xf32>
    %201 = arith.truncf %191 : vector<8x64xf32> to vector<8x64xbf16>
    %cst_89 = arith.constant dense<0.000000e+00> : vector<8x80xf32>
    %202 = tpu.matmul %201, %176, %cst_89 {dimension_numbers = #tpu.dot_dimension_numbers<[1], [0], [0], [1], [0, 0, 1, 1], [], []>} : vector<8x64xbf16>, vector<64x80xbf16>, vector<8x80xf32> -> vector<8x80xf32>
    %203 = arith.addf %200, %202 : vector<8x80xf32>
    %204 = arith.truncf %198 : vector<8x64xf32> to vector<8x64xbf16>
    %cst_90 = arith.constant dense<0.000000e+00> : vector<8x80xf32>
    %205 = tpu.matmul %204, %178, %cst_90 {dimension_numbers = #tpu.dot_dimension_numbers<[1], [0], [0], [1], [0, 0, 1, 1], [], []>} : vector<8x64xbf16>, vector<64x80xbf16>, vector<8x80xf32> -> vector<8x80xf32>
    %206 = arith.addf %203, %205 : vector<8x80xf32>
    %207 = vector.broadcast %181 : vector<1x80xf32> to vector<8x80xf32>
    %208 = arith.addf %206, %207 : vector<8x80xf32>
    %cst_91 = arith.constant 0.000000e+00 : f32
    %209 = vector.broadcast %cst_91 : f32 to vector<8x80xf32>
    %210 = arith.maximumf %208, %209 : vector<8x80xf32>
    %c7_i32_92 = arith.constant 7 : i32
    %211 = tpu.dynamic_rotate %210 by %c7_i32_92 dim 0 : vector<8x80xf32>, i32 -> vector<8x80xf32>
    %212 = arith.maximumf %210, %211 : vector<8x80xf32>
    %c1680_93 = arith.constant 1680 : index
    %c0_94 = arith.constant 0 : index
    %213 = vector.load %arg2[%c1680_93, %c0_94] : memref<1712x256xbf16, #tpu.memory_space<vmem>>, vector<4x8xbf16>
    %214 = arith.truncf %212 : vector<8x80xf32> to vector<8x80xbf16>
    %cst_95 = arith.constant dense<0.000000e+00> : vector<4x80xf32>
    %215 = tpu.matmul %213, %214, %cst_95 {dimension_numbers = #tpu.dot_dimension_numbers<[1], [0], [0], [1], [0, 0, 1, 1], [], []>} : vector<4x8xbf16>, vector<8x80xbf16>, vector<4x80xf32> -> vector<4x80xf32>
    %cst_96 = arith.constant dense<0.000000e+00> : vector<80xf32>
    %216 = vector.multi_reduction <add>, %215, %cst_96 [0] : vector<4x80xf32> to vector<80xf32>
    %217 = vector.shape_cast %216 : vector<80xf32> to vector<1x80xf32>
    %cst_97 = arith.constant 4.000000e+00 : f32
    %218 = vector.broadcast %cst_97 : f32 to vector<1x80xf32>
    %219 = arith.divf %217, %218 : vector<1x80xf32>
    %220 = arith.truncf %219 : vector<1x80xf32> to vector<1x80xbf16>
    %cst_98 = arith.constant dense<0.000000e+00> : vector<1x80xf32>
    %221 = tpu.matmul %220, %179, %cst_98 {dimension_numbers = #tpu.dot_dimension_numbers<[1], [0], [0], [1], [0, 0, 1, 1], [], []>} : vector<1x80xbf16>, vector<80x80xbf16>, vector<1x80xf32> -> vector<1x80xf32>
    %222 = arith.addf %221, %182 : vector<1x80xf32>
    %223 = arith.negf %222 : vector<1x80xf32>
    %224 = math.exp %223 : vector<1x80xf32>
    %cst_99 = arith.constant 1.000000e+00 : f32
    %225 = vector.broadcast %cst_99 : f32 to vector<1x80xf32>
    %226 = arith.addf %225, %224 : vector<1x80xf32>
    %227 = arith.divf %225, %226 : vector<1x80xf32>
    %228 = vector.broadcast %227 : vector<1x80xf32> to vector<4x80xf32>
    %229 = arith.mulf %215, %228 : vector<4x80xf32>
    %230 = arith.truncf %229 : vector<4x80xf32> to vector<4x80xbf16>
    %cst_100 = arith.constant dense<0.000000e+00> : vector<4x80xf32>
    %231 = tpu.matmul %230, %180, %cst_100 {dimension_numbers = #tpu.dot_dimension_numbers<[1], [0], [0], [1], [0, 0, 1, 1], [], []>} : vector<4x80xbf16>, vector<80x80xbf16>, vector<4x80xf32> -> vector<4x80xf32>
    %232 = vector.broadcast %183 : vector<1x80xf32> to vector<4x80xf32>
    %233 = arith.addf %231, %232 : vector<4x80xf32>
    %c864 = arith.constant 864 : index
    %c0_101 = arith.constant 0 : index
    %234 = vector.load %arg2[%c864, %c0_101] : memref<1712x256xbf16, #tpu.memory_space<vmem>>, vector<80x160xbf16>
    %c944 = arith.constant 944 : index
    %c0_102 = arith.constant 0 : index
    %235 = vector.load %arg2[%c944, %c0_102] : memref<1712x256xbf16, #tpu.memory_space<vmem>>, vector<80x160xbf16>
    %c1024 = arith.constant 1024 : index
    %c0_103 = arith.constant 0 : index
    %236 = vector.load %arg2[%c1024, %c0_103] : memref<1712x256xbf16, #tpu.memory_space<vmem>>, vector<80x160xbf16>
    %c1104 = arith.constant 1104 : index
    %c0_104 = arith.constant 0 : index
    %237 = vector.load %arg2[%c1104, %c0_104] : memref<1712x256xbf16, #tpu.memory_space<vmem>>, vector<160x160xbf16>
    %c1264 = arith.constant 1264 : index
    %c0_105 = arith.constant 0 : index
    %238 = vector.load %arg2[%c1264, %c0_105] : memref<1712x256xbf16, #tpu.memory_space<vmem>>, vector<160x256xbf16>
    %c96 = arith.constant 96 : index
    %c0_106 = arith.constant 0 : index
    %239 = vector.load %arg3[%c96, %c0_106] : memref<128x256xf32, #tpu.memory_space<vmem>>, vector<1x160xf32>
    %c104 = arith.constant 104 : index
    %c0_107 = arith.constant 0 : index
    %240 = vector.load %arg3[%c104, %c0_107] : memref<128x256xf32, #tpu.memory_space<vmem>>, vector<1x160xf32>
    %c112 = arith.constant 112 : index
    %c0_108 = arith.constant 0 : index
    %241 = vector.load %arg3[%c112, %c0_108] : memref<128x256xf32, #tpu.memory_space<vmem>>, vector<1x256xf32>
    %242 = tpu.iota {dimensions = array<i32: 0>} : vector<4x1xi32>
    %c1_i32_109 = arith.constant 1 : i32
    %243 = tpu.dynamic_rotate %233 by %c1_i32_109 dim 0 : vector<4x80xf32>, i32 -> vector<4x80xf32>
    %c0_i32_110 = arith.constant 0 : i32
    %244 = vector.broadcast %c0_i32_110 : i32 to vector<4x1xi32>
    %245 = arith.cmpi sgt, %242, %244 : vector<4x1xi32>
    %246 = arith.extui %245 : vector<4x1xi1> to vector<4x1xi32>
    %247 = arith.sitofp %246 : vector<4x1xi32> to vector<4x1xf32>
    %248 = vector.broadcast %247 : vector<4x1xf32> to vector<4x80xf32>
    %249 = arith.mulf %243, %248 : vector<4x80xf32>
    %c3_i32 = arith.constant 3 : i32
    %250 = tpu.dynamic_rotate %233 by %c3_i32 dim 0 : vector<4x80xf32>, i32 -> vector<4x80xf32>
    %c3_i32_111 = arith.constant 3 : i32
    %251 = vector.broadcast %c3_i32_111 : i32 to vector<4x1xi32>
    %252 = arith.cmpi slt, %242, %251 : vector<4x1xi32>
    %253 = arith.extui %252 : vector<4x1xi1> to vector<4x1xi32>
    %254 = arith.sitofp %253 : vector<4x1xi32> to vector<4x1xf32>
    %255 = vector.broadcast %254 : vector<4x1xf32> to vector<4x80xf32>
    %256 = arith.mulf %250, %255 : vector<4x80xf32>
    %257 = arith.truncf %233 : vector<4x80xf32> to vector<4x80xbf16>
    %cst_112 = arith.constant dense<0.000000e+00> : vector<4x160xf32>
    %258 = tpu.matmul %257, %235, %cst_112 {dimension_numbers = #tpu.dot_dimension_numbers<[1], [0], [0], [1], [0, 0, 1, 1], [], []>} : vector<4x80xbf16>, vector<80x160xbf16>, vector<4x160xf32> -> vector<4x160xf32>
    %259 = arith.truncf %249 : vector<4x80xf32> to vector<4x80xbf16>
    %cst_113 = arith.constant dense<0.000000e+00> : vector<4x160xf32>
    %260 = tpu.matmul %259, %234, %cst_113 {dimension_numbers = #tpu.dot_dimension_numbers<[1], [0], [0], [1], [0, 0, 1, 1], [], []>} : vector<4x80xbf16>, vector<80x160xbf16>, vector<4x160xf32> -> vector<4x160xf32>
    %261 = arith.addf %258, %260 : vector<4x160xf32>
    %262 = arith.truncf %256 : vector<4x80xf32> to vector<4x80xbf16>
    %cst_114 = arith.constant dense<0.000000e+00> : vector<4x160xf32>
    %263 = tpu.matmul %262, %236, %cst_114 {dimension_numbers = #tpu.dot_dimension_numbers<[1], [0], [0], [1], [0, 0, 1, 1], [], []>} : vector<4x80xbf16>, vector<80x160xbf16>, vector<4x160xf32> -> vector<4x160xf32>
    %264 = arith.addf %261, %263 : vector<4x160xf32>
    %265 = vector.broadcast %239 : vector<1x160xf32> to vector<4x160xf32>
    %266 = arith.addf %264, %265 : vector<4x160xf32>
    %cst_115 = arith.constant 0.000000e+00 : f32
    %267 = vector.broadcast %cst_115 : f32 to vector<4x160xf32>
    %268 = arith.maximumf %266, %267 : vector<4x160xf32>
    %c3_i32_116 = arith.constant 3 : i32
    %269 = tpu.dynamic_rotate %268 by %c3_i32_116 dim 0 : vector<4x160xf32>, i32 -> vector<4x160xf32>
    %270 = arith.maximumf %268, %269 : vector<4x160xf32>
    %c1680_117 = arith.constant 1680 : index
    %c0_118 = arith.constant 0 : index
    %271 = vector.load %arg2[%c1680_117, %c0_118] : memref<1712x256xbf16, #tpu.memory_space<vmem>>, vector<2x4xbf16>
    %272 = arith.truncf %270 : vector<4x160xf32> to vector<4x160xbf16>
    %cst_119 = arith.constant dense<0.000000e+00> : vector<2x160xf32>
    %273 = tpu.matmul %271, %272, %cst_119 {dimension_numbers = #tpu.dot_dimension_numbers<[1], [0], [0], [1], [0, 0, 1, 1], [], []>} : vector<2x4xbf16>, vector<4x160xbf16>, vector<2x160xf32> -> vector<2x160xf32>
    %cst_120 = arith.constant dense<0.000000e+00> : vector<160xf32>
    %274 = vector.multi_reduction <add>, %273, %cst_120 [0] : vector<2x160xf32> to vector<160xf32>
    %275 = vector.shape_cast %274 : vector<160xf32> to vector<1x160xf32>
    %cst_121 = arith.constant 2.000000e+00 : f32
    %276 = vector.broadcast %cst_121 : f32 to vector<1x160xf32>
    %277 = arith.divf %275, %276 : vector<1x160xf32>
    %278 = arith.truncf %277 : vector<1x160xf32> to vector<1x160xbf16>
    %cst_122 = arith.constant dense<0.000000e+00> : vector<1x160xf32>
    %279 = tpu.matmul %278, %237, %cst_122 {dimension_numbers = #tpu.dot_dimension_numbers<[1], [0], [0], [1], [0, 0, 1, 1], [], []>} : vector<1x160xbf16>, vector<160x160xbf16>, vector<1x160xf32> -> vector<1x160xf32>
    %280 = arith.addf %279, %240 : vector<1x160xf32>
    %281 = arith.negf %280 : vector<1x160xf32>
    %282 = math.exp %281 : vector<1x160xf32>
    %cst_123 = arith.constant 1.000000e+00 : f32
    %283 = vector.broadcast %cst_123 : f32 to vector<1x160xf32>
    %284 = arith.addf %283, %282 : vector<1x160xf32>
    %285 = arith.divf %283, %284 : vector<1x160xf32>
    %286 = vector.broadcast %285 : vector<1x160xf32> to vector<2x160xf32>
    %287 = arith.mulf %273, %286 : vector<2x160xf32>
    %288 = arith.truncf %287 : vector<2x160xf32> to vector<2x160xbf16>
    %cst_124 = arith.constant dense<0.000000e+00> : vector<2x256xf32>
    %289 = tpu.matmul %288, %238, %cst_124 {dimension_numbers = #tpu.dot_dimension_numbers<[1], [0], [0], [1], [0, 0, 1, 1], [], []>} : vector<2x160xbf16>, vector<160x256xbf16>, vector<2x256xf32> -> vector<2x256xf32>
    %290 = vector.broadcast %241 : vector<1x256xf32> to vector<2x256xf32>
    %291 = arith.addf %289, %290 : vector<2x256xf32>
    %cst_125 = arith.constant dense<0.000000e+00> : vector<256xf32>
    %292 = vector.multi_reduction <add>, %291, %cst_125 [0] : vector<2x256xf32> to vector<256xf32>
    %293 = vector.shape_cast %292 : vector<256xf32> to vector<1x256xf32>
    %cst_126 = arith.constant 2.000000e+00 : f32
    %294 = vector.broadcast %cst_126 : f32 to vector<1x256xf32>
    %295 = arith.divf %293, %294 : vector<1x256xf32>
    %c0_127 = arith.constant 0 : index
    %c0_128 = arith.constant 0 : index
    %c0_129 = arith.constant 0 : index
    %296 = vector.load %arg4[%c0_127, %c0_128, %c0_129] : memref<1x1x256xf32, #tpu.memory_space<vmem>>, vector<1x1x256xf32>
    %297 = vector.shape_cast %296 : vector<1x1x256xf32> to vector<1x256xf32>
    %298 = vector.shape_cast %295 : vector<1x256xf32> to vector<1x1x256xf32>
    tpu.vector_store %arg4[%c0_127, %c0_128, %c0_129], %298 {strides = array<i32>} : memref<1x1x256xf32, #tpu.memory_space<vmem>>, vector<1x1x256xf32>,
    %c1424 = arith.constant 1424 : index
    %c0_130 = arith.constant 0 : index
    %299 = vector.load %arg2[%c1424, %c0_130] : memref<1712x256xbf16, #tpu.memory_space<vmem>>, vector<256x128xbf16>
    %c120_131 = arith.constant 120 : index
    %c0_132 = arith.constant 0 : index
    %300 = vector.load %arg3[%c120_131, %c0_132] : memref<128x256xf32, #tpu.memory_space<vmem>>, vector<1x128xf32>
    %301 = arith.truncf %295 : vector<1x256xf32> to vector<1x256xbf16>
    %cst_133 = arith.constant dense<0.000000e+00> : vector<1x128xf32>
    %302 = tpu.matmul %301, %299, %cst_133 {dimension_numbers = #tpu.dot_dimension_numbers<[1], [0], [0], [1], [0, 0, 1, 1], [], []>} : vector<1x256xbf16>, vector<256x128xbf16>, vector<1x128xf32> -> vector<1x128xf32>
    %303 = arith.addf %302, %300 : vector<1x128xf32>
    %cst_134 = arith.constant 0.000000e+00 : f32
    %304 = vector.broadcast %cst_134 : f32 to vector<1x128xf32>
    %305 = arith.maximumf %303, %304 : vector<1x128xf32>
    %c0_135 = arith.constant 0 : index
    %c0_136 = arith.constant 0 : index
    %c0_137 = arith.constant 0 : index
    %306 = vector.load %arg5[%c0_135, %c0_136, %c0_137] : memref<1x1x128xf32, #tpu.memory_space<vmem>>, vector<1x1x128xf32>
    %307 = vector.shape_cast %306 : vector<1x1x128xf32> to vector<1x128xf32>
    %308 = vector.shape_cast %305 : vector<1x128xf32> to vector<1x1x128xf32>
    tpu.vector_store %arg5[%c0_135, %c0_136, %c0_137], %308 {strides = array<i32>} : memref<1x1x128xf32, #tpu.memory_space<vmem>>, vector<1x1x128xf32>,
    return
  }
  func.func @transform_0(%arg0: i32) -> (i32, i32, i32) {
    %c0_i32 = arith.constant 0 : i32
    %c0_i32_0 = arith.constant 0 : i32
    %c0_i32_1 = arith.constant 0 : i32
    return %arg0, %c0_i32, %c0_i32_0 : i32, i32, i32
  }
  func.func @transform_1(%arg0: i32) -> (i32, i32) {
    %c0_i32 = arith.constant 0 : i32
    %c0_i32_0 = arith.constant 0 : i32
    %c0_i32_1 = arith.constant 0 : i32
    return %c0_i32, %c0_i32_0 : i32, i32
  }
  func.func @transform_2(%arg0: i32) -> (i32, i32) {
    %c0_i32 = arith.constant 0 : i32
    %c0_i32_0 = arith.constant 0 : i32
    %c0_i32_1 = arith.constant 0 : i32
    return %c0_i32, %c0_i32_0 : i32, i32
  }
  func.func @transform_3(%arg0: i32) -> (i32, i32, i32) {
    %c0_i32 = arith.constant 0 : i32
    %c0_i32_0 = arith.constant 0 : i32
    %c0_i32_1 = arith.constant 0 : i32
    return %arg0, %c0_i32, %c0_i32_0 : i32, i32, i32
  }
  func.func @transform_4(%arg0: i32) -> (i32, i32, i32) {
    %c0_i32 = arith.constant 0 : i32
    %c0_i32_0 = arith.constant 0 : i32
    %c0_i32_1 = arith.constant 0 : i32
    return %arg0, %c0_i32, %c0_i32_0 : i32, i32, i32
  }
}

</mosaic_0001>

<bundles_post_ra>
// kernel: forward.1
= control target key start
LH: loop header
LB: loop body
LE: loop exit
PB: predicated region body
PF: predicated region fallthrough
CT: control target
= control target key end

     0   :  { %10 = vsyncpa [#allocation3], 0  ;;  %s4204_s0 = inlined_call_operand.vmem [shape: f32[2,64,4], index: 0, kind: input, shape index: {}]   ;;  %s4205_s1 = inlined_call_operand.hbm [shape: bf16[1712,256], index: 1, kind: input, shape index: {}]   ;;  %s4206_s2 = inlined_call_operand.hbm [shape: f32[128,256], index: 2, kind: input, shape index: {}]   ;;  %s4207_s3 = inlined_call_operand.vmem [shape: f32[2,1,256], index: 3, kind: output, shape index: {0}]   ;;  %s4208_s4 = inlined_call_operand.hbm [shape: f32[2,1,128], index: 4, kind: output, shape index: {1}]  }
   0x1   :  { %11 = vsyncpa [#allocation6], 0 }
   0x2   :  { %12 = vsyncpa [#allocation4], 0 }
   0x3   :  { %14 = vsyncpa [#allocation4 + $0x1], 0  ;;  %s3863_s15 = smov 0   ;;  %s3865_s16 = smov 0  }
   0x4   :  { %s3867_s17 = smov 0   ;;  %s3869_s18 = smov 0  }
   0x5 LB: > { %s3884_s19 = sadd.s32 4294967295, %s3824_s18   ;;  %s2815_s20 = sadd.s32 4294967294, %s3824_s18   ;;  %s3824_s18 = sphi %s3869_s18, %s4215_s18   ;;  %s3820_s17 = sphi %s3867_s17, %s4214_s17   ;;  %s3816_s16 = sphi %s3865_s16, %s4213_s16   ;;  %s3812_s15 = sphi %s3863_s15, %s4212_s15  }
   0x6   : > { %s3888_s21 = sadd.s32 1, %s3824_s18   ;;  %s121_s22 = sadd.s32 1, %s3820_s17 }
   0x7   : > { %s118_s23 = ssub.s32 %s3824_s18, %s3888_s21  ;;  %p131_p0 = scmp.ne.s32.totalorder %s3820_s17, %s3816_s16 }
   0x8   : > { %p119_p1 = scmp.eq.s32.totalorder %s118_s23, 0  ;;  %p132_p2 = scmp.eq.s32.totalorder %s3884_s19, 1 }
   0x9   : > { %p137_p3 = scmp.ne.s32.totalorder %s3816_s16, %s3812_s15  ;;  %p138_p4 = scmp.eq.s32.totalorder %s2815_s20, 1 }
   0xa   : > { %s3899_s24 = scalar_select %p119_p1, %s3820_s17, %s121_s22  }
   0xb   : > { %p3901_p5 = por %p132_p2, %p131_p0  ;;  %p3905_p6 = por %p138_p4, %p137_p3 }
   0xc   : > { %p2816_p7 = scmp.ge.s32.totalorder %s3824_s18, 1  ;;  %p145_p8 = scmp.lt.s32.totalorder %s3824_s18, 3 }
   0xd   : > { %p3611_p9 = scmp.eq.s32.totalorder %s3884_s19, 0  ;;  %s156_s30 = sshll.u32 %s4205_s1, 4  ;;  %s157_s30 = int_to_ptr.hbm [resolvable:$true] %s156_s30 }
   0xe   : > { %p3912_p10 = pnand %p2816_p7, %p145_p8  ;;  %s3826_s5 = smov [#allocation2]  }
   0xf   : > { %s158_s6 = sshll.u32 %s3826_s5, 4  ;;  %s170_s9 = sshll.u32 %s4206_s2, 4  ;;  %s159_s6 = int_to_ptr.vmem [resolvable:$true] %s158_s6  ;;  %s171_s9 = int_to_ptr.hbm [resolvable:$true] %s170_s9 }
  0x10   : > { %p3600_p11 = pneg %p3912_p10  ;;  %s3827_s10 = smov 128  }
  0x11   : > { %s3828_s11 = smov 8   ;;  %s3829_s12 = smov [#allocation5]  }
  0x12   : > { %p3601_p12 = pnand %p3611_p9, %p3600_p11  ;;  %s172_s13 = sshll.u32 %s3829_s12, 4  ;;  %s173_s13 = int_to_ptr.vmem [resolvable:$true] %s172_s13 }
  0x13   : > { %s3830_s14 = smov 256   ;;  %s3831_s20 = smov 16  }
  0x14   : > { %3603 = dma.hbm_to_vmem [thread:$0]  (!%p3601_p12), %s157_s30, 27392, %s159_s6, [#allocation3], %s3827_s10, %s3827_s10, %s3828_s11  }
  0x15   : > { %3606 = dma.hbm_to_vmem [thread:$0]  (!%p3601_p12), %s171_s9, 4096, %s173_s13, [#allocation6], %s3830_s14, %s3830_s14, %s3831_s20  }
  0x16   : > { %196 = sbr.rel (%p3912_p10) target bundleno = 3375 (0xd2f), region = 32 }
  0x1b   : > { %3799 = dma.done.wait (%p3611_p9), [#allocation3], 27392  }
  0x1c   : > { %3801 = vsyncadd (%p3611_p9), [#allocation3], 4294939904 }
  0x1d   : > { %3803 = dma.done.wait (%p3611_p9), [#allocation6], 4096  }
  0x1e   : > { %3805 = vsyncadd (%p3611_p9), [#allocation6], 4294963200  ;;  %p231_p13 = scmp.lt.s32.totalorder %s3884_s19, 1  ;;  %v263_v0 = vlaneseq  ;;  %vm391_vm0 = vcmask 1041408   ;;  %vm378_vm1 = vcmask 31744   ;;  %v3832_v19 = vmov 0.0   ;;  %s2710_s11 = scalar_lea.hbm %s4208_s4, %s3884_s19 }
  0x1f   : > { %v250_v2 = vld [vmem:[#allocation2 + $0x8] sm:$0x3]  ;;  %v251_v3 = vld [vmem:[#allocation2 + $0x10] sm:$0x3]  ;;  %v249_v4 = vld [vmem:[#allocation2] sm:$0x3] }
  0x20   : > { %s3938_s22 = scalar_select %p231_p13, %s3884_s19, 1  ;;  %v3941_v1 = vshrl.u32 %v263_v0, 7  ;;  %v437_v5 = vsel %vm391_vm0, %v250_v2, 0  ;;  %v485_v6 = vsel %vm391_vm0, %v251_v3, 0  ;;  %v393_v7 = vsel %vm391_vm0, %v249_v4, 0 }
  0x21   : > { %446 = vmatpush.bf16.msra.mxu1 %v437_v5  ;;  %494 = vmatpush.bf16.msra.mxu2 %v485_v6  ;;  %vm582_vm6 = vcmask 523264   ;;  %vm608_vm7 = vcmask 261120   ;;  %vm987_vm14 = vcmask 1043456   ;;  %vm950_vm15 = vcmask 326656   ;;  %s229_s8 = sand.u32 1, %s3816_s16   ;;  %s2714_s14 = sshll.u32 %s2710_s11, 4  ;;  %s2715_s14 = int_to_ptr.hbm [resolvable:$true] %s2714_s14 }
  0x22   : > { %s3446_s23 = sshll.u32 %s3938_s22, 6  ;;  %vm329_vm2 = vcmp.lt.s32.totalorder %v3941_v1, 7  ;;  %vm280_vm3 = vcmp.lt.s32.totalorder %v3941_v1, 1  ;;  %vm289_vm4 = vcmp.gt.s32.totalorder %v3941_v1, 0  ;;  %402 = vmatpush.bf16.msra.mxu0 %v393_v7  ;;  %v271_v54 = vadd.s32 56, %v3941_v1  ;;  %s2825_s30 = sshll.u32 %s3938_s22, 1 }
  0x23   : > { %s3947_s29 = scalar_lea.vmem %s4204_s0, %s3446_s23  ;;  %v3967_v20 = vsel %vm289_vm4, 1.0, %v3832_v19  ;;  %s239_s7 = scalar_lea.vmem %s4207_s3, %s2825_s30 }
  0x24   : > { %v3956_v8 = vld [vmem:[%s3947_s29] sm:$0xff]  ;;  %v242_v9 = vld [vmem:[%s3947_s29 + $0x8] sm:$0xff]  ;;  %v243_v10 = vld [vmem:[%s3947_s29 + $0x10] sm:$0xff]  ;;  %vm345_vm5 = vcmp.lt.s32.totalorder %v271_v54, 63  ;;  %s230_s12 = scalar_lea.vmem [#allocation7], %s229_s8  ;;  %s2699_s20 = scalar_lea.sflag [#allocation4], %s229_s8 }
  0x25   : > { %v272_v11 = vrot.slane %v3956_v8, 7  ;;  %v273_v12 = vrot.slane %v242_v9, 7  ;;  %v321_v13 = vrot.slane %v3956_v8, 1  ;;  %v322_v14 = vrot.slane %v242_v9, 1  ;;  %v248_v15 = vld [vmem:[%s3947_s29 + $0x38] sm:$0xff]  ;;  %v245_v29 = vld [vmem:[%s3947_s29 + $0x20] sm:$0xff] }
  0x26   : > { %v370_v16 = vpack.c.bf16 %v242_v9, %v3956_v8  ;;  %v323_v17 = vrot.slane %v243_v10, 1  ;;  %v279_v18 = vrot.slane %v248_v15, 7  ;;  %v244_v28 = vld [vmem:[%s3947_s29 + $0x18] sm:$0xff]  ;;  %v325_v31 = vrot.slane %v245_v29, 1  ;;  %v246_v41 = vld [vmem:[%s3947_s29 + $0x28] sm:$0xff]  ;;  %v247_v42 = vld [vmem:[%s3947_s29 + $0x30] sm:$0xff] }
  0x27   : > { %v336_v21 = vsel %vm329_vm2, %v321_v13, %v322_v14  ;;  %v287_v23 = vsel %vm280_vm3, %v272_v11, %v273_v12  ;;  %v324_v30 = vrot.slane %v244_v28, 1  ;;  %v275_v32 = vrot.slane %v244_v28, 7  ;;  %s2712_s13 = sshll.u32 %s230_s12, 4  ;;  %s3768_s22 = sshra.s32 %s2715_s14, 4  ;;  %s2713_s13 = int_to_ptr.vmem [resolvable:$true] %s2712_s13  ;;  %s3769_s22 = int_to_ptr.hbm [resolvable:$true] %s3768_s22 }
  0x28   : > { %2832 = vmatmul.msk.bf16.vlgmr.msra.gmra.mxu1 %vm378_vm1, %v370_v16  ;;  %v335_v22 = vsel %vm329_vm2, %v322_v14, %v323_v17  ;;  %v288_v24 = vsel %vm280_vm3, %v279_v18, %v272_v11  ;;  %v274_v33 = vrot.slane %v243_v10, 7  ;;  %v371_v34 = vpack.c.bf16 %v244_v28, %v243_v10  ;;  %s3770_s23 = scalar_lea.hbm %s3769_s22, 1  ;;  %s3774_s28 = scalar_lea.hbm %s4208_s4, 2 }
  0x29   : > { %v468_v25 = vpack.c.bf16 %v335_v22, %v336_v21  ;;  %v313_v26 = vmul.f32 %v3967_v20, %v288_v24  ;;  %v333_v35 = vsel %vm329_vm2, %v324_v30, %v325_v31  ;;  %v334_v36 = vsel %vm329_vm2, %v323_v17, %v324_v30  ;;  %p3771_p0 = scmp.ne.s32.totalorder %s3769_s22, %s3770_s23  ;;  %p3775_p3 = scmp.lt.s32.totalorder %s3769_s22, %s4208_s4 }
  0x2a   : > { %v285_v37 = vsel %vm280_vm3, %v274_v33, %v275_v32  ;;  %v286_v38 = vsel %vm280_vm3, %v273_v12, %v274_v33  ;;  %v469_v39 = vpack.c.bf16 %v333_v35, %v334_v36  ;;  %v326_v43 = vrot.slane %v246_v41, 1  ;;  %v260_v33 = vld [vmem:[#allocation5] ss:$0 sm:$0xff]  ;;  %p3776_p4 = scmp.lt.s32.totalorder %s3774_s28, %s3770_s23 }
  0x2b   : > { %2836 = vmatmul.msk.bf16.vlgmr.msra.gmra.mxu2 %vm378_vm1, %v468_v25  ;;  %v374_v27 = vpack.c.bf16 %v287_v23, %v313_v26  ;;  %v375_v40 = vpack.c.bf16 %v285_v37, %v286_v38  ;;  %v327_v44 = vrot.slane %v247_v42, 1  ;;  %v277_v45 = vrot.slane %v246_v41, 7  ;;  %p3772_p1 = pnand %p3771_p0, %p3901_p5 }
  0x2c   : > { %v276_v46 = vrot.slane %v245_v29, 7  ;;  %v372_v47 = vpack.c.bf16 %v246_v41, %v245_v29  ;;  %v332_v49 = vsel %vm329_vm2, %v325_v31, %v326_v43  ;;  %v328_v55 = vrot.slane %v248_v15, 1  ;;  %p3777_p7 = por %p3776_p4, %p3775_p3 }
  0x2d   : > { %2828 = vmatmul.msk.bf16.vlgmr.msra.gmra.mxu0 %vm378_vm1, %v374_v27  ;;  %v331_v48 = vsel %vm329_vm2, %v326_v43, %v327_v44  ;;  %v2827_v57 = vsel %vm345_vm5, 1.0, %v3832_v19  ;;  %v278_v58 = vrot.slane %v247_v42, 7  ;;  %v373_v60 = vpack.c.bf16 %v248_v15, %v247_v42  ;;  %p3773_p2 = pneg %p3772_p1 }
  0x2e   : > { %v283_v50 = vsel %vm280_vm3, %v276_v46, %v277_v45  ;;  %v284_v51 = vsel %vm280_vm3, %v275_v32, %v276_v46  ;;  %v470_v52 = vpack.c.bf16 %v331_v48, %v332_v49  ;;  %v337_v56 = vsel %vm329_vm2, %v328_v55, %v321_v13 }
  0x2f   : > { %v376_v53 = vpack.c.bf16 %v283_v50, %v284_v51  ;;  %v369_v59 = vmul.f32 %v2827_v57, %v337_v56  ;;  %v330_v61 = vsel %vm329_vm2, %v327_v44, %v328_v55  ;;  %v281_v62 = vsel %vm280_vm3, %v278_v58, %v279_v18  ;;  %p3778_p8 = pnand %p3777_p7, %p3773_p2 }
  0x30   : > { %v282_v63 = vsel %vm280_vm3, %v277_v45, %v278_v58 }
  0x31   : > { %v471_v2 = vpack.c.bf16 %v369_v59, %v330_v61  ;;  %v377_v3 = vpack.c.bf16 %v281_v62, %v282_v63 }
  0x38   : > { %2833 = vmatmul.msk.bf16.gmra.mxu1 %vm378_vm1, %v371_v34 }
  0x3b   : > { %2837 = vmatmul.msk.bf16.gmra.mxu2 %vm378_vm1, %v469_v39 }
  0x3d   : > { %2829 = vmatmul.msk.bf16.gmra.mxu0 %vm378_vm1, %v375_v40 }
  0x48   : > { %2834 = vmatmul.msk.bf16.gmra.mxu1 %vm378_vm1, %v372_v47 }
  0x4b   : > { %2838 = vmatmul.msk.bf16.gmra.mxu2 %vm378_vm1, %v470_v52 }
  0x4d   : > { %2830 = vmatmul.msk.bf16.gmra.mxu0 %vm378_vm1, %v376_v53 }
  0x58   : > { %2835 = vmatmul.msk.bf16.gmra.mxu1 %vm378_vm1, %v373_v60 }
  0x5b   : > { %2839 = vmatmul.msk.bf16.gmra.mxu2 %vm378_vm1, %v471_v2 }
  0x5d   : > { %2831 = vmatmul.msk.bf16.gmra.mxu0 %vm378_vm1, %v377_v3 }
  0xa5   : > { %v448_v4 = vpop.f32.mrf.mxu1 }
  0xaa   : > { %v404_v5 = vpop.f32.mrf.mxu0 }
  0xab   : > { %v449_v27 = vadd.f32 %v448_v4, %v404_v5 }
  0xad   : > { %v450_v6 = vpop.f32.mrf.mxu1 }
  0xae   : > { %v496_v7 = vpop.f32.mrf.mxu2 }
  0xaf   : > { %v516_v32 = vadd.f32 %v496_v7, %v449_v27 }
  0xb1   : > { %v524_v40 = vadd.f32 %v516_v32, %v260_v33  ;;  %v2842_v32 = vld [vmem:[#allocation2 + $0x690] sm:$0xf] }
  0xb2   : > { %v406_v8 = vpop.f32.mrf.mxu0 }
  0xb3   : > { %v451_v47 = vadd.f32 %v450_v6, %v406_v8  ;;  %v532_v51 = vmax.f32 %v524_v40, 0.0  ;;  %v2852_v40 = vld [vmem:[#allocation2 + $0x18] sm:$0xf] }
  0xb5   : > { %v453_v9 = vpop.f32.mrf.mxu1  ;;  %v540_v60 = vrot.slane %v532_v51, 1 }
  0xb6   : > { %v498_v10 = vpop.f32.mrf.mxu2 }
  0xb7   : > { %v517_v52 = vadd.f32 %v498_v10, %v451_v47 }
  0xb9   : > { %v525_v61 = vadd.f32 %v517_v52, %v260_v33 }
  0xba   : > { %v409_v11 = vpop.f32.mrf.mxu0 }
  0xbb   : > { %v454_v35 = vadd.f32 %v453_v9, %v409_v11  ;;  %v533_v10 = vmax.f32 %v525_v61, 0.0 }
  0xbd   : > { %v455_v12 = vpop.f32.mrf.mxu1 }
  0xbe   : > { %v501_v13 = vpop.f32.mrf.mxu2 }
  0xbf   : > { %v518_v45 = vadd.f32 %v501_v13, %v454_v35 }
  0xc1   : > { %v526_v56 = vadd.f32 %v518_v45, %v260_v33 }
  0xc2   : > { %v411_v14 = vpop.f32.mrf.mxu0 }
  0xc3   : > { %v456_v37 = vadd.f32 %v455_v12, %v411_v14  ;;  %v534_v3 = vmax.f32 %v526_v56, 0.0 }
  0xc5   : > { %v458_v16 = vpop.f32.mrf.mxu1 }
  0xc6   : > { %v503_v15 = vpop.f32.mrf.mxu2 }
  0xc7   : > { %v519_v42 = vadd.f32 %v503_v15, %v456_v37  ;;  %v542_v15 = vrot.slane %v534_v3, 1  ;;  %v2856_v37 = vld [vmem:[#allocation2 + $0x28] sm:$0xf] }
  0xc9   : > { %v527_v53 = vadd.f32 %v519_v42, %v260_v33 }
  0xca   : > { %v414_v17 = vpop.f32.mrf.mxu0 }
  0xcb   : > { %v459_v29 = vadd.f32 %v458_v16, %v414_v17  ;;  %v535_v62 = vmax.f32 %v527_v53, 0.0 }
  0xcd   : > { %v460_v21 = vpop.f32.mrf.mxu1  ;;  %v543_v11 = vrot.slane %v535_v62, 1 }
  0xce   : > { %v506_v18 = vpop.f32.mrf.mxu2 }
  0xcf   : > { %v520_v38 = vadd.f32 %v506_v18, %v459_v29  ;;  %v541_v18 = vrot.slane %v533_v10, 1  ;;  %v2846_v29 = vld [vmem:[#allocation2 + $0x6a0] sm:$0xf] }
  0xd1   : > { %v528_v48 = vadd.f32 %v520_v38, %v260_v33  ;;  %v3448_v38 = vld [vmem:[#allocation2 + $0x2c] sm:$0xf0] }
  0xd2   : > { %v416_v22 = vpop.f32.mrf.mxu0 }
  0xd3   : > { %v461_v30 = vadd.f32 %v460_v21, %v416_v22  ;;  %v536_v57 = vmax.f32 %v528_v48, 0.0  ;;  %v552_v21 = vsel %vm329_vm2, %v542_v15, %v543_v11 }
  0xd5   : > { %v463_v24 = vpop.f32.mrf.mxu1  ;;  %v544_v4 = vrot.slane %v536_v57, 1 }
  0xd6   : > { %v508_v23 = vpop.f32.mrf.mxu2 }
  0xd7   : > { %v521_v34 = vadd.f32 %v508_v23, %v461_v30  ;;  %v551_v16 = vsel %vm329_vm2, %v543_v11, %v544_v4  ;;  %v2862_v11 = vld [vmem:[#allocation2 + $0x38] sm:$0xf] }
  0xd8   : > { %v559_v23 = vmax.f32 %v535_v62, %v551_v16 }
  0xd9   : > { %v529_v43 = vadd.f32 %v521_v34, %v260_v33 }
  0xda   : > { %v419_v25 = vpop.f32.mrf.mxu0 }
  0xdb   : > { %v464_v26 = vadd.f32 %v463_v24, %v419_v25  ;;  %v537_v54 = vmax.f32 %v529_v43, 0.0  ;;  %v553_v24 = vsel %vm329_vm2, %v541_v18, %v542_v15  ;;  %v558_v25 = vmax.f32 %v534_v3, %v552_v21 }
  0xdd   : > { %v465_v41 = vpop.f32.mrf.mxu1  ;;  %v545_v63 = vrot.slane %v537_v54, 1  ;;  %v569_v27 = vpack.c.bf16 %v559_v23, %v558_v25 }
  0xde   : > { %v511_v28 = vpop.f32.mrf.mxu2 }
  0xdf   : > { %v522_v31 = vadd.f32 %v511_v28, %v464_v26  ;;  %v550_v12 = vsel %vm329_vm2, %v544_v4, %v545_v63  ;;  %v554_v26 = vsel %vm329_vm2, %v540_v60, %v541_v18  ;;  %v557_v28 = vmax.f32 %v533_v10, %v553_v24  ;;  %v261_v10 = vld [vmem:[#allocation5 + $0x10] ss:$0 sm:$0xff] }
  0xe0   : > { %v560_v17 = vmax.f32 %v536_v57, %v550_v12  ;;  %v556_v30 = vmax.f32 %v532_v51, %v554_v26  ;;  %v3449_v12 = vld [vmem:[#allocation2 + $0x3c] sm:$0xf0] }
  0xe1   : > { %v530_v39 = vadd.f32 %v522_v31, %v260_v33  ;;  %v3452_v31 = vld [vmem:[#allocation2 + $0x6a4] sm:$0xf0] }
  0xe2   : > { %v421_v36 = vpop.f32.mrf.mxu0  ;;  %v568_v34 = vpack.c.bf16 %v557_v28, %v556_v30  ;;  %v2847_v35 = vor.u32 %v3452_v31, %v2846_v29 }
  0xe3   : > { %v466_v44 = vadd.f32 %v465_v41, %v421_v36  ;;  %v538_v49 = vmax.f32 %v530_v39, 0.0  ;;  %v2857_v39 = vor.u32 %v3448_v38, %v2856_v37  ;;  %v3447_v41 = vld [vmem:[#allocation2 + $0x1c] sm:$0xf0] }
  0xe4   : > { %v2853_v42 = vor.u32 %v3447_v41, %v2852_v40  ;;  %v3456_v40 = vld [vmem:[#allocation2 + $0x8c] sm:$0xf0] }
  0xe5   : > { %v546_v58 = vrot.slane %v538_v49, 1 }
  0xe6   : > { %v513_v46 = vpop.f32.mrf.mxu2 }
  0xe7   : > { %v523_v50 = vadd.f32 %v513_v46, %v466_v44  ;;  %v549_v7 = vsel %vm329_vm2, %v545_v63, %v546_v58  ;;  %v3833_v44 = vmov 32.0  }
  0xe8   : > { %v561_v14 = vmax.f32 %v537_v54, %v549_v7  ;;  %3660 = vrcp.f32 %v3833_v44  ;;  %v2866_v7 = vld [vmem:[#allocation2 + $0x48] sm:$0xf]  ;;  %v3455_v44 = vld [vmem:[#allocation2 + $0x7c] sm:$0xf0] }
  0xe9   : > { %v531_v55 = vadd.f32 %v523_v50, %v260_v33  ;;  %v3451_v33 = vld [vmem:[#allocation2 + $0x694] sm:$0xf0] }
  0xea   : > { %v570_v22 = vpack.c.bf16 %v561_v14, %v560_v17  ;;  %v2843_v36 = vor.u32 %v3451_v33, %v2842_v32  ;;  %v2863_v14 = vor.u32 %v3449_v12, %v2862_v11 }
  0xeb   : > { %v539_v59 = vmax.f32 %v531_v55, 0.0 }
  0xed   : > { %v547_v2 = vrot.slane %v539_v59, 1 }
  0xee   : > { %v3661_v46 = vpop.eup %3660 }
  0xef   : > { %v548_v5 = vsel %vm329_vm2, %v546_v58, %v547_v2  ;;  %v555_v6 = vsel %vm329_vm2, %v547_v2, %v540_v60  ;;  %v623_v51 = vmul.f32 32.0, %v3661_v46  ;;  %vm627_vm8 = vweird.f32 %v3661_v46 }
  0xf0   : > { %v562_v8 = vmax.f32 %v538_v49, %v548_v5  ;;  %v563_v9 = vmax.f32 %v539_v59, %v555_v6 }
  0xf1   : > { %v624_v56 = vsub.f32 1.0, %v623_v51 }
  0xf2   : > { %v571_v13 = vpack.c.bf16 %v563_v9, %v562_v8  ;;  %v3450_v8 = vld [vmem:[#allocation2 + $0x4c] sm:$0xf0] }
  0xf3   : > { %v625_v59 = vmul.f32 %v3661_v46, %v624_v56  ;;  %v2867_v9 = vor.u32 %v3450_v8, %v2866_v7 }
  0xf4   : > { %593 = vmatpush.bf16.msrb.mxu0 %v571_v13  ;;  %3586 = vmatpush.bf16.msra.mxu3 %v571_v13 }
  0xf5   : > { %v626_v62 = vadd.f32 %v3661_v46, %v625_v59 }
  0xf7   : > { %v628_v3 = vsel %vm627_vm8, %v3661_v46, %v626_v62 }
  0xf8   : > { %594 = vmatpush.bf16.msrb.mxu0 %v570_v22  ;;  %3587 = vmatpush.bf16.msra.mxu3 %v570_v22 }
  0xfc   : > { %595 = vmatpush.bf16.msrb.mxu0 %v569_v27  ;;  %3588 = vmatpush.bf16.msra.mxu3 %v569_v27 }
 0x100   : > { %596 = vmatpush.bf16.msrb.mxu0 %v568_v34  ;;  %3589 = vmatpush.bf16.msra.mxu3 %v568_v34 }
 0x103   : > { %2849 = vmatmul.msk.bf16.vlgmr.msra.gmra.mxu3 %vm582_vm6, %v2847_v35  ;;  %2848 = vmatmul.msk.bf16.vlgmr.msrb.gmra.mxu0 %vm582_vm6, %v2843_v36 }
 0x104   : > { %652 = vmatpush.bf16.msrb.mxu3 %v2857_v39  ;;  %v2887_v39 = vld [vmem:[#allocation2 + $0x88] sm:$0xf] }
 0x105   : > { %v2888_v41 = vor.u32 %v3456_v40, %v2887_v39 }
 0x107   : > { %848 = vmatpush.bf16.msrb.mxu1 %v2888_v41 }
 0x108   : > { %653 = vmatpush.bf16.msrb.mxu3 %v2853_v42  ;;  %v2883_v42 = vld [vmem:[#allocation2 + $0x78] sm:$0xf] }
 0x109   : > { %v2884_v46 = vor.u32 %v3455_v44, %v2883_v42 }
 0x10b   : > { %849 = vmatpush.bf16.msrb.mxu1 %v2884_v46 }
 0x10c   : > { %709 = vmatpush.bf16.msra.mxu3 %v2867_v9 }
 0x110   : > { %710 = vmatpush.bf16.msra.mxu3 %v2863_v14 }
 0x180   : > { %v598_v43 = vpop.f32.mrf.mxu0 }
 0x181   : > { %v609_v48 = vsel %vm608_vm7, %v598_v43, 0.0 }
 0x186   : > { %v603_v45 = vpop.f32.mrf.mxu3 }
 0x187   : > { %v612_v52 = vsel %vm608_vm7, %v603_v45, 0.0 }
 0x188   : > { %v600_v47 = vpop.f32.mrf.mxu0 }
 0x189   : > { %v610_v49 = vsel %vm608_vm7, %v600_v47, 0.0 }
 0x18a   : > { %v611_v50 = vadd.f32 %v610_v49, %v609_v48  ;;  %v2897_v48 = vld [vmem:[#allocation2 + $0xa8] sm:$0xf]  ;;  %v3458_v49 = vld [vmem:[#allocation2 + $0xac] sm:$0xf0] }
 0x18c   : > { %v613_v53 = vadd.f32 %v612_v52, %v611_v50  ;;  %v3457_v50 = vld [vmem:[#allocation2 + $0x9c] sm:$0xf0]  ;;  %v3454_v52 = vld [vmem:[#allocation2 + $0x6c] sm:$0xf0] }
 0x18e   : > { %v605_v54 = vpop.f32.mrf.mxu3 }
 0x18f   : > { %v614_v55 = vsel %vm608_vm7, %v605_v54, 0.0 }
 0x190   : > { %v615_v57 = vadd.f32 %v614_v55, %v613_v53  ;;  %v3453_v55 = vld [vmem:[#allocation2 + $0x5c] sm:$0xf0] }
 0x192   : > { %v616_v58 = vrot.slane %v615_v57, 4 }
 0x194   : > { %v617_v60 = vadd.f32 %v616_v58, %v615_v57  ;;  %v262_v58 = vld [vmem:[#allocation5 + $0x20] ss:$0 sm:$0xff] }
 0x196   : > { %v618_v61 = vrot.slane %v617_v60, 2 }
 0x198   : > { %v619_v63 = vadd.f32 %v618_v61, %v617_v60 }
 0x19a   : > { %v620_v2 = vrot.slane %v619_v63, 1 }
 0x19c   : > { %v621_v4 = vadd.f32 %v620_v2, %v619_v63 }
 0x19e   : > { %v629_v5 = vmul.f32 %v628_v3, %v621_v4 }
 0x1a0   : > { %v630_v6 = vpack.c.bf16 %v629_v5, %v629_v5 }
 0x1a2   : > { %2858 = vmatmul.msk.bf16.vlgmr.msrb.gmra.mxu3 %vm608_vm7, %v630_v6 }
 0x225   : > { %v655_v13 = vpop.f32.mrf.mxu3 }
 0x226   : > { %v656_v15 = vadd.f32 %v655_v13, %v261_v10  ;;  %v267_v10 = vadd.s32 24, %v3941_v1 }
 0x228   : > { %v2859_v16 = vmul.f32 -1.442695, %v656_v15  ;;  %vm770_vm13 = vcmp.lt.s32.totalorder %v267_v10, 31 }
 0x22a   : > { %3662 = vpow2.f32 %v2859_v16 }
 0x22d   : > { %v657_v17 = vpop.f32.mrf.mxu3 }
 0x230   : > { %v3663_v18 = vpop.eup %3662 }
 0x231   : > { %v662_v21 = vadd.f32 1.0, %v3663_v18 }
 0x233   : > { %3664 = vrcp.f32 %v662_v21  ;;  %v674_v25 = vand.u32 2147483648, %v662_v21  ;;  %v672_v27 = vand.u32 2147483647, %v662_v21  ;;  %vm668_vm10 = vweird.f32 %v662_v21 }
 0x235   : > { %v675_v29 = vor.u32 1.1754944e-38, %v674_v25  ;;  %vm673_vm12 = vcmp.eq.f32.partialorder %v672_v27, 8.507059e+37 }
 0x239   : > { %v3665_v22 = vpop.eup %3664 }
 0x23a   : > { %v664_v23 = vmul.f32 %v3665_v22, %v662_v21  ;;  %vm669_vm9 = vweird.f32 %v3665_v22 }
 0x23b   : > { %vm670_vm11 = vmor %vm668_vm10, %vm669_vm9 }
 0x23c   : > { %v665_v24 = vsub.f32 1.0, %v664_v23  ;;  %v2870_v23 = vsel %vm770_vm13, 1.0, %v3832_v19 }
 0x23e   : > { %v666_v26 = vmul.f32 %v3665_v22, %v665_v24 }
 0x240   : > { %v667_v28 = vadd.f32 %v3665_v22, %v666_v26 }
 0x242   : > { %v671_v30 = vsel %vm670_vm11, %v3665_v22, %v667_v28 }
 0x243   : > { %v676_v31 = vsel %vm673_vm12, %v675_v29, %v671_v30 }
 0x244   : > { %v678_v32 = vperm.slane %v676_v31, 0 }
 0x246   : > { %v679_v33 = vmul.f32 %v678_v32, %v598_v43  ;;  %v680_v34 = vmul.f32 %v678_v32, %v600_v47  ;;  %v681_v36 = vmul.f32 %v678_v32, %v603_v45  ;;  %v682_v37 = vmul.f32 %v678_v32, %v605_v54  ;;  %v2893_v47 = vld [vmem:[#allocation2 + $0x98] sm:$0xf]  ;;  %v2877_v45 = vld [vmem:[#allocation2 + $0x68] sm:$0xf] }
 0x247   : > { %v2898_v43 = vor.u32 %v3458_v49, %v2897_v48  ;;  %v2894_v51 = vor.u32 %v3457_v50, %v2893_v47  ;;  %v2878_v53 = vor.u32 %v3454_v52, %v2877_v45  ;;  %v2873_v54 = vld [vmem:[#allocation2 + $0x58] sm:$0xf] }
 0x248   : > { %v683_v35 = vpack.c.bf16 %v680_v34, %v679_v33  ;;  %v684_v38 = vpack.c.bf16 %v682_v37, %v681_v36  ;;  %v2874_v56 = vor.u32 %v3453_v55, %v2873_v54 }
 0x249   : > { %887 = vmatpush.bf16.msrb.mxu2 %v2898_v43  ;;  %811 = vmatpush.bf16.msra.mxu0 %v2878_v53  ;;  %v744_v43 = vld [vmem:[#allocation5 + $0x30] ss:$0 sm:$0xff] }
 0x24a   : > { %2868 = vmatmul.msk.bf16.vlgmr.msra.gmra.mxu3 %vm608_vm7, %v683_v35 }
 0x24d   : > { %888 = vmatpush.bf16.msrb.mxu2 %v2894_v51  ;;  %812 = vmatpush.bf16.msra.mxu0 %v2874_v56 }
 0x25a   : > { %2869 = vmatmul.msk.bf16.gmra.mxu3 %vm608_vm7, %v684_v38 }
 0x2cd   : > { %v712_v57 = vpop.f32.mrf.mxu3 }
 0x2ce   : > { %v713_v60 = vadd.f32 %v712_v57, %v262_v58 }
 0x2d0   : > { %v759_v4 = vrot.slane %v713_v60, 1  ;;  %v747_v12 = vrot.slane %v713_v60, 7 }
 0x2d5   : > { %v714_v59 = vpop.f32.mrf.mxu3 }
 0x2d6   : > { %v715_v61 = vadd.f32 %v714_v59, %v262_v58 }
 0x2d8   : > { %v783_v62 = vpack.c.bf16 %v715_v61, %v713_v60  ;;  %v760_v2 = vrot.slane %v715_v61, 1  ;;  %v748_v13 = vrot.slane %v715_v61, 7 }
 0x2da   : > { %2889 = vmatmul.msk.bf16.vlgmr.msrb.gmra.mxu1 %vm608_vm7, %v783_v62  ;;  %v765_v7 = vsel %vm329_vm2, %v759_v4, %v760_v2  ;;  %v753_v21 = vsel %vm280_vm3, %v747_v12, %v748_v13 }
 0x2dd   : > { %v717_v63 = vpop.f32.mrf.mxu3 }
 0x2de   : > { %v718_v3 = vadd.f32 %v717_v63, %v262_v58 }
 0x2e0   : > { %v761_v5 = vrot.slane %v718_v3, 1  ;;  %v749_v28 = vrot.slane %v718_v3, 7 }
 0x2e2   : > { %v764_v6 = vsel %vm329_vm2, %v760_v2, %v761_v5  ;;  %v752_v30 = vsel %vm280_vm3, %v748_v13, %v749_v28  ;;  %v3463_v13 = vld [vmem:[#allocation2 + $0x694] sm:$0xf0] }
 0x2e3   : > { %v861_v8 = vpack.c.bf16 %v764_v6, %v765_v7 }
 0x2e5   : > { %v719_v9 = vpop.f32.mrf.mxu3  ;;  %2899 = vmatmul.msk.bf16.vlgmr.msrb.gmra.mxu2 %vm608_vm7, %v861_v8 }
 0x2e6   : > { %v720_v11 = vadd.f32 %v719_v9, %v262_v58 }
 0x2e8   : > { %v750_v14 = vrot.slane %v720_v11, 7  ;;  %v762_v15 = vrot.slane %v720_v11, 1  ;;  %v784_v16 = vpack.c.bf16 %v720_v11, %v718_v3 }
 0x2ea   : > { %v754_v17 = vsel %vm280_vm3, %v750_v14, %v747_v12  ;;  %2890 = vmatmul.msk.bf16.gmra.mxu1 %vm608_vm7, %v784_v16  ;;  %v766_v22 = vsel %vm329_vm2, %v762_v15, %v759_v4  ;;  %v763_v26 = vsel %vm329_vm2, %v761_v5, %v762_v15  ;;  %v751_v29 = vsel %vm280_vm3, %v749_v28, %v750_v14  ;;  %v2903_v12 = vld [vmem:[#allocation2 + $0x690] sm:$0xf]  ;;  %v738_v16 = vld [vmem:[#allocation2 + $0xd8] sm:$0xf] }
 0x2eb   : > { %v755_v18 = vmul.f32 %v3967_v20, %v754_v17  ;;  %v782_v25 = vmul.f32 %v2870_v23, %v766_v22  ;;  %v786_v31 = vpack.c.bf16 %v751_v29, %v752_v30  ;;  %v2904_v15 = vor.u32 %v3463_v13, %v2903_v12  ;;  %v2912_v22 = vld [vmem:[#allocation2 + $0xc8] sm:$0xf]  ;;  %v3460_v23 = vld [vmem:[#allocation2 + $0xcc] sm:$0xf0] }
 0x2ec   : > { %v978_v17 = vunpack.c.l.b16 %v738_v16  ;;  %v3834_v28 = vmov 16.0  }
 0x2ed   : > { %v785_v24 = vpack.c.bf16 %v753_v21, %v755_v18  ;;  %v862_v27 = vpack.c.bf16 %v782_v25, %v763_v26  ;;  %v2908_v25 = vld [vmem:[#allocation2 + $0xb8] sm:$0xf]  ;;  %v3459_v26 = vld [vmem:[#allocation2 + $0xbc] sm:$0xf0]  ;;  %3666 = vrcp.f32 %v3834_v28  ;;  %v3467_v28 = vld [vmem:[#allocation2 + $0x144] sm:$0xf0] }
 0x2ee   : > { %v981_v18 = vpack.c.b16 %v978_v17, %v978_v17  ;;  %v1071_v17 = vld [vmem:[#allocation2 + $0x150] sm:$0xf] }
 0x2ef   : > { %2879 = vmatmul.msk.bf16.vlgmr.msra.gmra.mxu0 %vm608_vm7, %v785_v24  ;;  %v2913_v24 = vor.u32 %v3460_v23, %v2912_v22  ;;  %v1066_v23 = vld [vmem:[#allocation2 + $0x128] sm:$0xf] }
 0x2f0   : > { %v989_v21 = vsel %vm987_vm14, %v981_v18, 0  ;;  %v1160_v18 = vunpack.c.l.b16 %v1071_v17 }
 0x2f1   : > { %996 = vmatpush.bf16.msrb.mxu0 %v989_v21 }
 0x2f2   : > { %v1163_v21 = vpack.c.b16 %v1160_v18, %v1160_v18 }
 0x2f3   : > { %v3667_v30 = vpop.eup %3666 }
 0x2f4   : > { %vm965_vm4 = vweird.f32 %v3667_v30  ;;  %v1170_v22 = vsel %vm987_vm14, %v1163_v21, 0 }
 0x2f5   : > { %2900 = vmatmul.msk.bf16.gmra.mxu2 %vm608_vm7, %v862_v27  ;;  %997 = vmatpush.bf16.msrb.mxu0 %v2913_v24  ;;  %v2909_v27 = vor.u32 %v3459_v26, %v2908_v25  ;;  %v1076_v24 = vld [vmem:[#allocation2 + $0x178] sm:$0xf]  ;;  %v1125_v25 = vunpack.c.l.b16 %v1066_v23 }
 0x2f6   : > { %v1196_v26 = vunpack.c.l.b16 %v1076_v24 }
 0x2f9   : > { %998 = vmatpush.bf16.msrb.mxu0 %v2909_v27  ;;  %v2941_v27 = vld [vmem:[#allocation2 + $0x140] sm:$0xf] }
 0x2ff   : > { %2880 = vmatmul.msk.bf16.gmra.mxu0 %vm608_vm7, %v786_v31  ;;  %v961_v31 = vmul.f32 16.0, %v3667_v30 }
 0x357   : > { %v851_v32 = vpop.f32.mrf.mxu1 }
 0x35f   : > { %v853_v35 = vpop.f32.mrf.mxu1 }
 0x367   : > { %v856_v38 = vpop.f32.mrf.mxu1 }
 0x368   : > { %v890_v33 = vpop.f32.mrf.mxu2 }
 0x36c   : > { %v814_v34 = vpop.f32.mrf.mxu0 }
 0x36d   : > { %v852_v41 = vadd.f32 %v851_v32, %v814_v34 }
 0x36f   : > { %v900_v48 = vadd.f32 %v890_v33, %v852_v41  ;;  %v858_v50 = vpop.f32.mrf.mxu1 }
 0x370   : > { %v892_v36 = vpop.f32.mrf.mxu2 }
 0x371   : > { %v904_v45 = vadd.f32 %v900_v48, %v744_v43 }
 0x373   : > { %v908_v57 = vmax.f32 %v904_v45, 0.0 }
 0x374   : > { %v816_v37 = vpop.f32.mrf.mxu0 }
 0x375   : > { %v854_v42 = vadd.f32 %v853_v35, %v816_v37  ;;  %v912_v62 = vrot.slane %v908_v57, 1  ;;  %v962_v35 = vsub.f32 1.0, %v961_v31  ;;  %v1128_v31 = vpack.c.b16 %v1125_v25, %v1125_v25 }
 0x377   : > { %v901_v49 = vadd.f32 %v892_v36, %v854_v42 }
 0x378   : > { %v895_v39 = vpop.f32.mrf.mxu2 }
 0x379   : > { %v905_v52 = vadd.f32 %v901_v49, %v744_v43 }
 0x37b   : > { %v909_v58 = vmax.f32 %v905_v52, 0.0  ;;  %v2922_v52 = vld [vmem:[#allocation2 + $0xf0] sm:$0xf] }
 0x37c   : > { %v819_v40 = vpop.f32.mrf.mxu0 }
 0x37d   : > { %v857_v44 = vadd.f32 %v856_v38, %v819_v40  ;;  %v913_v63 = vrot.slane %v909_v58, 1  ;;  %v963_v38 = vmul.f32 %v3667_v30, %v962_v35  ;;  %v3466_v35 = vld [vmem:[#allocation2 + $0x134] sm:$0xf0] }
 0x37f   : > { %v902_v46 = vadd.f32 %v895_v39, %v857_v44  ;;  %v918_v8 = vsel %vm329_vm2, %v912_v62, %v913_v63  ;;  %v964_v41 = vadd.f32 %v3667_v30, %v963_v38  ;;  %v3465_v38 = vld [vmem:[#allocation2 + $0x11c] sm:$0xf0] }
 0x380   : > { %v897_v54 = vpop.f32.mrf.mxu2  ;;  %v920_v11 = vmax.f32 %v908_v57, %v918_v8  ;;  %v745_v57 = vld [vmem:[#allocation5 + $0x40] ss:$0 sm:$0xff] }
 0x381   : > { %v906_v47 = vadd.f32 %v902_v46, %v744_v43  ;;  %v966_v46 = vsel %vm965_vm4, %v3667_v30, %v964_v41  ;;  %v2942_v30 = vor.u32 %v3467_v28, %v2941_v27  ;;  %v3469_v41 = vld [vmem:[#allocation2 + $0x16c] sm:$0xf0] }
 0x383   : > { %v910_v55 = vmax.f32 %v906_v47, 0.0  ;;  %v743_v47 = vld [vmem:[#allocation2 + $0x100] sm:$0xf] }
 0x384   : > { %v821_v51 = vpop.f32.mrf.mxu0 }
 0x385   : > { %v859_v53 = vadd.f32 %v858_v50, %v821_v51  ;;  %v914_v60 = vrot.slane %v910_v55, 1  ;;  %v1036_v50 = vunpack.c.l.b16 %v743_v47 }
 0x387   : > { %v903_v56 = vadd.f32 %v897_v54, %v859_v53  ;;  %v917_v5 = vsel %vm329_vm2, %v913_v63, %v914_v60  ;;  %v1039_v51 = vpack.c.b16 %v1036_v50, %v1036_v50  ;;  %v3462_v53 = vld [vmem:[#allocation2 + $0xf4] sm:$0xf0]  ;;  %v2918_v54 = vld [vmem:[#allocation2 + $0xe0] sm:$0xf] }
 0x388   : > { %v921_v10 = vmax.f32 %v909_v58, %v917_v5 }
 0x389   : > { %v907_v59 = vadd.f32 %v903_v56, %v744_v43  ;;  %v1046_v45 = vsel %vm987_vm14, %v1039_v51, 0  ;;  %v3461_v56 = vld [vmem:[#allocation2 + $0xe4] sm:$0xf0]  ;;  %v746_v51 = vld [vmem:[#allocation5 + $0x50] ss:$0 sm:$0xff] }
 0x38a   : > { %v926_v14 = vpack.c.bf16 %v921_v10, %v920_v11  ;;  %1053 = vmatpush.bf16.msra.mxu1 %v1046_v45  ;;  %v2919_v58 = vor.u32 %v3461_v56, %v2918_v54  ;;  %v265_v45 = vadd.s32 8, %v3941_v1 }
 0x38b   : > { %v911_v61 = vmax.f32 %v907_v59, 0.0 }
 0x38c   : > { %vm1107_vm11 = vcmp.lt.s32.totalorder %v265_v45, 15 }
 0x38d   : > { %v915_v2 = vrot.slane %v911_v61, 1  ;;  %v2925_v56 = vsel %vm1107_vm11, 1.0, %v3832_v19 }
 0x38f   : > { %v919_v3 = vsel %vm329_vm2, %v915_v2, %v912_v62  ;;  %v916_v4 = vsel %vm329_vm2, %v914_v60, %v915_v2 }
 0x390   : > { %v923_v6 = vmax.f32 %v911_v61, %v919_v3  ;;  %v922_v7 = vmax.f32 %v910_v55, %v916_v4  ;;  %v2923_v55 = vor.u32 %v3462_v53, %v2922_v52 }
 0x392   : > { %v927_v9 = vpack.c.bf16 %v923_v6, %v922_v7  ;;  %1054 = vmatpush.bf16.msra.mxu1 %v2923_v55 }
 0x394   : > { %942 = vmatpush.bf16.msrb.mxu3 %v927_v9 }
 0x396   : > { %1055 = vmatpush.bf16.msra.mxu1 %v2919_v58 }
 0x398   : > { %943 = vmatpush.bf16.msrb.mxu3 %v926_v14 }
 0x39b   : > { %2905 = vmatmul.msk.bf16.vlgmr.msrb.gmra.mxu3 %vm608_vm7, %v2904_v15 }
 0x39c   : > { %1177 = vmatpush.bf16.msra.mxu3 %v1170_v22 }
 0x3a0   : > { %1178 = vmatpush.bf16.msra.mxu3 %v2942_v30 }
 0x41e   : > { %v945_v29 = vpop.f32.mrf.mxu3 }
 0x41f   : > { %v951_v33 = vsel %vm950_vm15, %v945_v29, 0.0 }
 0x426   : > { %v947_v32 = vpop.f32.mrf.mxu3 }
 0x427   : > { %v952_v34 = vsel %vm950_vm15, %v947_v32, 0.0 }
 0x428   : > { %v953_v36 = vadd.f32 %v952_v34, %v951_v33  ;;  %v1199_v33 = vpack.c.b16 %v1196_v26, %v1196_v26  ;;  %v2937_v34 = vld [vmem:[#allocation2 + $0x130] sm:$0xf] }
 0x42a   : > { %v954_v37 = vrot.slane %v953_v36, 4 }
 0x42c   : > { %v955_v39 = vadd.f32 %v954_v37, %v953_v36  ;;  %v2938_v36 = vor.u32 %v3466_v35, %v2937_v34  ;;  %v2932_v37 = vld [vmem:[#allocation2 + $0x118] sm:$0xf]  ;;  %v2964_v35 = vld [vmem:[#allocation2 + $0x1a0] sm:$0xf] }
 0x42e   : > { %v956_v40 = vrot.slane %v955_v39, 2  ;;  %1179 = vmatpush.bf16.msra.mxu3 %v2938_v36  ;;  %v3472_v36 = vld [vmem:[#allocation2 + $0x1a4] sm:$0xf0] }
 0x430   : > { %v957_v42 = vadd.f32 %v956_v40, %v955_v39  ;;  %v2950_v39 = vld [vmem:[#allocation2 + $0x168] sm:$0xf]  ;;  %v2933_v40 = vor.u32 %v3465_v38, %v2932_v37  ;;  %v2965_v37 = vor.u32 %v3472_v36, %v2964_v35  ;;  %v2960_v38 = vld [vmem:[#allocation2 + $0x190] sm:$0xf]  ;;  %v3483_v35 = vld [vmem:[#allocation2 + $0x254] sm:$0xf0] }
 0x431   : > { %v3034_v36 = vld [vmem:[#allocation2 + $0x2a0] sm:$0xf] }
 0x432   : > { %v958_v44 = vrot.slane %v957_v42, 1 }
 0x434   : > { %v959_v48 = vadd.f32 %v958_v44, %v957_v42  ;;  %v2951_v42 = vor.u32 %v3469_v41, %v2950_v39  ;;  %v2928_v44 = vld [vmem:[#allocation2 + $0x108] sm:$0xf]  ;;  %v3471_v39 = vld [vmem:[#allocation2 + $0x194] sm:$0xf0]  ;;  %v2956_v41 = vld [vmem:[#allocation2 + $0x180] sm:$0xf] }
 0x436   : > { %v967_v49 = vmul.f32 %v966_v46, %v959_v48  ;;  %v3464_v46 = vld [vmem:[#allocation2 + $0x10c] sm:$0xf0] }
 0x437   : > { %v2929_v48 = vor.u32 %v3464_v46, %v2928_v44  ;;  %v3835_v46 = vmov 8.0  }
 0x438   : > { %v968_v43 = vpack.c.bf16 %v967_v49, %v967_v49  ;;  %v2946_v49 = vld [vmem:[#allocation2 + $0x158] sm:$0xf] }
 0x43a   : > { %2914 = vmatmul.msk.bf16.vlgmr.msrb.gmra.mxu0 %vm950_vm15, %v968_v43  ;;  %v3468_v43 = vld [vmem:[#allocation2 + $0x15c] sm:$0xf0] }
 0x43b   : > { %v2947_v47 = vor.u32 %v3468_v43, %v2946_v49 }
 0x4b7   : > { %v1000_v59 = vpop.f32.mrf.mxu0 }
 0x4b8   : > { %v1001_v60 = vadd.f32 %v1000_v59, %v745_v57 }
 0x4ba   : > { %v2915_v61 = vmul.f32 -1.442695, %v1001_v60 }
 0x4bc   : > { %3668 = vpow2.f32 %v2915_v61 }
 0x4bf   : > { %v1002_v62 = vpop.f32.mrf.mxu0 }
 0x4c2   : > { %v3669_v63 = vpop.eup %3668 }
 0x4c3   : > { %v1007_v2 = vadd.f32 1.0, %v3669_v63 }
 0x4c5   : > { %3670 = vrcp.f32 %v1007_v2  ;;  %v1019_v6 = vand.u32 2147483648, %v1007_v2  ;;  %v1017_v8 = vand.u32 2147483647, %v1007_v2  ;;  %vm1013_vm8 = vweird.f32 %v1007_v2 }
 0x4c6   : > { %3672 = vrcp.f32 %v3835_v46 }
 0x4c7   : > { %v1020_v10 = vor.u32 1.1754944e-38, %v1019_v6  ;;  %vm1018_vm10 = vcmp.eq.f32.partialorder %v1017_v8, 8.507059e+37 }
 0x4cb   : > { %v3671_v3 = vpop.eup %3670 }
 0x4cc   : > { %v1009_v4 = vmul.f32 %v3671_v3, %v1007_v2  ;;  %vm1014_vm5 = vweird.f32 %v3671_v3 }
 0x4cd   : > { %vm1015_vm9 = vmor %vm1013_vm8, %vm1014_vm5  ;;  %vm1621_vm8 = vcmask 654336  }
 0x4ce   : > { %v1010_v5 = vsub.f32 1.0, %v1009_v4 }
 0x4d0   : > { %v1011_v7 = vmul.f32 %v3671_v3, %v1010_v5 }
 0x4d2   : > { %v1012_v9 = vadd.f32 %v3671_v3, %v1011_v7 }
 0x4d4   : > { %v1016_v11 = vsel %vm1015_vm9, %v3671_v3, %v1012_v9 }
 0x4d5   : > { %v1021_v12 = vsel %vm1018_vm10, %v1020_v10, %v1016_v11 }
 0x4d6   : > { %v1023_v13 = vperm.slane %v1021_v12, 0  ;;  %v1093_v12 = vld [vmem:[#allocation5 + $0x60] ss:$0 sm:$0xff] }
 0x4d8   : > { %v1024_v14 = vmul.f32 %v1023_v13, %v945_v29  ;;  %v1025_v15 = vmul.f32 %v1023_v13, %v947_v32  ;;  %v1135_v29 = vsel %vm987_vm14, %v1128_v31, 0  ;;  %v1206_v32 = vsel %vm987_vm14, %v1199_v33, 0  ;;  %v1234_v33 = vld [vmem:[#allocation2 + $0x690] sm:$0xf] }
 0x4d9   : > { %1142 = vmatpush.bf16.msra.mxu2 %v1135_v29  ;;  %1213 = vmatpush.bf16.msra.mxu0 %v1206_v32  ;;  %v2968_v29 = vld [vmem:[#allocation2 + $0x1b0] sm:$0xf]  ;;  %v3473_v32 = vld [vmem:[#allocation2 + $0x1b4] sm:$0xf0] }
 0x4da   : > { %v1026_v16 = vpack.c.bf16 %v1025_v15, %v1024_v14  ;;  %v2969_v34 = vor.u32 %v3473_v32, %v2968_v29  ;;  %v3480_v29 = vld [vmem:[#allocation2 + $0x224] sm:$0xf0]  ;;  %v3013_v32 = vld [vmem:[#allocation2 + $0x250] sm:$0xf] }
 0x4dc   : > { %2924 = vmatmul.msk.bf16.vlgmr.msra.gmra.mxu1 %vm950_vm15, %v1026_v16 }
 0x4dd   : > { %1143 = vmatpush.bf16.msra.mxu2 %v2933_v40  ;;  %1214 = vmatpush.bf16.msra.mxu0 %v2951_v42  ;;  %v2961_v40 = vor.u32 %v3471_v39, %v2960_v38  ;;  %v3470_v42 = vld [vmem:[#allocation2 + $0x184] sm:$0xf0] }
 0x4de   : > { %v2957_v44 = vor.u32 %v3470_v42, %v2956_v41  ;;  %v3014_v41 = vor.u32 %v3483_v35, %v3013_v32 }
 0x4e1   : > { %1144 = vmatpush.bf16.msra.mxu2 %v2929_v48  ;;  %1215 = vmatpush.bf16.msra.mxu0 %v2947_v47  ;;  %v3673_v48 = vpop.eup %3672 }
 0x4e2   : > { %v1261_v49 = vmul.f32 8.0, %v3673_v48  ;;  %vm1265_vm12 = vweird.f32 %v3673_v48 }
 0x4e4   : > { %v1262_v43 = vsub.f32 1.0, %v1261_v49 }
 0x4e5   : > { %1300 = vmatpush.bf16.msrb.mxu2 %v2969_v34 }
 0x4e6   : > { %v1263_v45 = vmul.f32 %v3673_v48, %v1262_v43 }
 0x4e9   : > { %1301 = vmatpush.bf16.msrb.mxu2 %v2965_v37  ;;  %v3488_v37 = vld [vmem:[#allocation2 + $0x2a4] sm:$0xf0] }
 0x4ea   : > { %v3035_v38 = vor.u32 %v3488_v37, %v3034_v36 }
 0x4ed   : > { %1302 = vmatpush.bf16.msrb.mxu2 %v2961_v40 }
 0x4f1   : > { %1303 = vmatpush.bf16.msrb.mxu2 %v2957_v44 }
 0x559   : > { %v1057_v50 = vpop.f32.mrf.mxu1 }
 0x55a   : > { %v1058_v52 = vadd.f32 %v1057_v50, %v746_v51 }
 0x55c   : > { %v1096_v55 = vrot.slane %v1058_v52, 7  ;;  %v1102_v57 = vrot.slane %v1058_v52, 1 }
 0x561   : > { %v1059_v53 = vpop.f32.mrf.mxu1 }
 0x562   : > { %v1060_v54 = vadd.f32 %v1059_v53, %v746_v51 }
 0x564   : > { %v1097_v58 = vrot.slane %v1060_v54, 7  ;;  %v1103_v59 = vrot.slane %v1060_v54, 1  ;;  %v1114_v60 = vpack.c.bf16 %v1060_v54, %v1058_v52  ;;  %v1264_v54 = vadd.f32 %v3673_v48, %v1263_v45 }
 0x566   : > { %v1099_v61 = vsel %vm280_vm3, %v1097_v58, %v1096_v55  ;;  %v1105_v62 = vsel %vm329_vm2, %v1103_v59, %v1102_v57  ;;  %2943 = vmatmul.msk.bf16.vlgmr.msra.gmra.mxu3 %vm950_vm15, %v1114_v60  ;;  %v1098_v3 = vsel %vm280_vm3, %v1096_v55, %v1097_v58  ;;  %v1104_v4 = vsel %vm329_vm2, %v1102_v57, %v1103_v59 }
 0x567   : > { %v1100_v63 = vmul.f32 %v3967_v20, %v1099_v61  ;;  %v1113_v2 = vmul.f32 %v2925_v56, %v1105_v62  ;;  %vm1236_vm3 = vcmask 130048   ;;  %v1266_v58 = vsel %vm1265_vm12, %v3673_v48, %v1264_v54  ;;  %v2986_v62 = vld [vmem:[#allocation2 + $0x1f0] sm:$0xf] }
 0x568   : > { %vm1782_vm12 = vcmask 1047556  }
 0x569   : > { %v1115_v5 = vpack.c.bf16 %v1098_v3, %v1100_v63  ;;  %v1186_v6 = vpack.c.bf16 %v1113_v2, %v1104_v4  ;;  %v3477_v63 = vld [vmem:[#allocation2 + $0x1f4] sm:$0xf0]  ;;  %v2982_v3 = vld [vmem:[#allocation2 + $0x1e0] sm:$0xf]  ;;  %v3476_v4 = vld [vmem:[#allocation2 + $0x1e4] sm:$0xf0] }
 0x56a   : > { %v2987_v2 = vor.u32 %v3477_v63, %v2986_v62  ;;  %v3487_v62 = vld [vmem:[#allocation2 + $0x294] sm:$0xf0] }
 0x56b   : > { %2934 = vmatmul.msk.bf16.vlgmr.msra.gmra.mxu2 %vm950_vm15, %v1115_v5  ;;  %2952 = vmatmul.msk.bf16.vlgmr.msra.gmra.mxu0 %vm950_vm15, %v1186_v6  ;;  %v2983_v5 = vor.u32 %v3476_v4, %v2982_v3  ;;  %v2978_v6 = vld [vmem:[#allocation2 + $0x1d0] sm:$0xf]  ;;  %v2992_v3 = vld [vmem:[#allocation2 + $0x200] sm:$0xf]  ;;  %v3478_v4 = vld [vmem:[#allocation2 + $0x204] sm:$0xf0] }
 0x56c   : > { %1362 = vmatpush.bf16.msrb.mxu3 %v2987_v2 }
 0x570   : > { %1363 = vmatpush.bf16.msrb.mxu3 %v2983_v5  ;;  %v3026_v5 = vld [vmem:[#allocation2 + $0x280] sm:$0xf] }
 0x5e8   : > { %v1217_v8 = vpop.f32.mrf.mxu0 }
 0x5e9   : > { %v1181_v7 = vpop.f32.mrf.mxu3 }
 0x5ee   : > { %v1146_v9 = vpop.f32.mrf.mxu2 }
 0x5ef   : > { %v1182_v10 = vadd.f32 %v1181_v7, %v1146_v9  ;;  %v3475_v7 = vld [vmem:[#allocation2 + $0x1d4] sm:$0xf0] }
 0x5f0   : > { %v1219_v17 = vpop.f32.mrf.mxu0  ;;  %v2979_v9 = vor.u32 %v3475_v7, %v2978_v6  ;;  %v2993_v6 = vor.u32 %v3478_v4, %v2992_v3 }
 0x5f1   : > { %v1222_v11 = vadd.f32 %v1217_v8, %v1182_v10  ;;  %v1183_v13 = vpop.f32.mrf.mxu3  ;;  %v2974_v8 = vld [vmem:[#allocation2 + $0x1c0] sm:$0xf]  ;;  %v3474_v10 = vld [vmem:[#allocation2 + $0x1c4] sm:$0xf0] }
 0x5f2   : > { %1364 = vmatpush.bf16.msrb.mxu3 %v2979_v9 }
 0x5f3   : > { %v1224_v15 = vadd.f32 %v1222_v11, %v1093_v12  ;;  %v1094_v11 = vld [vmem:[#allocation5 + $0x70] ss:$0 sm:$0xff] }
 0x5f5   : > { %v1226_v21 = vmax.f32 %v1224_v15, 0.0 }
 0x5f6   : > { %v1148_v14 = vpop.f32.mrf.mxu2 }
 0x5f7   : > { %v1184_v16 = vadd.f32 %v1183_v13, %v1148_v14  ;;  %v1228_v24 = vrot.slane %v1226_v21, 1 }
 0x5f9   : > { %v1223_v18 = vadd.f32 %v1219_v17, %v1184_v16  ;;  %v3021_v16 = vld [vmem:[#allocation2 + $0x270] sm:$0xf]  ;;  %v3485_v17 = vld [vmem:[#allocation2 + $0x274] sm:$0xf0] }
 0x5fb   : > { %v1225_v22 = vadd.f32 %v1223_v18, %v1093_v12  ;;  %v2975_v12 = vor.u32 %v3474_v10, %v2974_v8  ;;  %v3004_v18 = vld [vmem:[#allocation2 + $0x230] sm:$0xf] }
 0x5fc   : > { %v1095_v8 = vld [vmem:[#allocation5 + $0x80] ss:$0 sm:$0xff] }
 0x5fd   : > { %v1227_v23 = vmax.f32 %v1225_v22, 0.0  ;;  %1365 = vmatpush.bf16.msrb.mxu3 %v2975_v12  ;;  %v3481_v22 = vld [vmem:[#allocation2 + $0x234] sm:$0xf0] }
 0x5ff   : > { %v1229_v25 = vrot.slane %v1227_v23, 1 }
 0x601   : > { %v1231_v26 = vsel %vm329_vm2, %v1229_v25, %v1228_v24  ;;  %v1230_v27 = vsel %vm329_vm2, %v1228_v24, %v1229_v25  ;;  %v3484_v24 = vld [vmem:[#allocation2 + $0x264] sm:$0xf0]  ;;  %v3005_v25 = vor.u32 %v3481_v22, %v3004_v18  ;;  %v3060_v22 = vld [vmem:[#allocation2 + $0x300] sm:$0xf] }
 0x602   : > { %v1233_v28 = vmax.f32 %v1227_v23, %v1231_v26  ;;  %v1232_v30 = vmax.f32 %v1226_v21, %v1230_v27  ;;  %v3022_v21 = vor.u32 %v3485_v17, %v3021_v16  ;;  %v3017_v23 = vld [vmem:[#allocation2 + $0x260] sm:$0xf]  ;;  %v3038_v26 = vld [vmem:[#allocation2 + $0x2b0] sm:$0xf]  ;;  %v3489_v27 = vld [vmem:[#allocation2 + $0x2b4] sm:$0xf0] }
 0x603   : > { %1457 = vmatpush.bf16.msrb.mxu0 %v3005_v25 }
 0x604   : > { %v1235_v31 = vpack.c.bf16 %v1233_v28, %v1232_v30  ;;  %v3000_v28 = vld [vmem:[#allocation2 + $0x220] sm:$0xf] }
 0x605   : > { %v3001_v34 = vor.u32 %v3480_v29, %v3000_v28 }
 0x606   : > { %1247 = vmatpush.bf16.msrb.mxu1 %v1235_v31  ;;  %v3018_v31 = vor.u32 %v3484_v24, %v3017_v23  ;;  %v3494_v23 = vld [vmem:[#allocation2 + $0x304] sm:$0xf0] }
 0x607   : > { %1458 = vmatpush.bf16.msrb.mxu0 %v3001_v34  ;;  %v3061_v24 = vor.u32 %v3494_v23, %v3060_v22  ;;  %v3066_v22 = vld [vmem:[#allocation2 + $0x310] sm:$0xf] }
 0x609   : > { %2953 = vmatmul.msk.bf16.vlgmr.msrb.gmra.mxu1 %vm1236_vm3, %v1234_v33  ;;  %v3039_v33 = vor.u32 %v3489_v27, %v3038_v26 }
 0x60a   : > { %1497 = vmatpush.bf16.msra.mxu1 %v3022_v21 }
 0x60b   : > { %1538 = vmatpush.bf16.msra.mxu2 %v3039_v33 }
 0x60e   : > { %1498 = vmatpush.bf16.msra.mxu1 %v3018_v31 }
 0x60f   : > { %1539 = vmatpush.bf16.msra.mxu2 %v3035_v38 }
 0x612   : > { %1499 = vmatpush.bf16.msra.mxu1 %v3014_v41  ;;  %v3056_v41 = vld [vmem:[#allocation2 + $0x2f0] sm:$0xf] }
 0x686   : > { %v4106_v47 = vpop.f32.mrf.mxu1 }
 0x687   : > { %v1253_v50 = vsel %vm582_vm6, %v4106_v47, 0.0 }
 0x688   : > { %v1254_v51 = vrot.slane %v1253_v50, 4 }
 0x68a   : > { %v1255_v52 = vadd.f32 %v1254_v51, %v1253_v50 }
 0x68c   : > { %v1256_v53 = vrot.slane %v1255_v52, 2 }
 0x68e   : > { %v1257_v55 = vadd.f32 %v1256_v53, %v1255_v52  ;;  %v1251_v56 = vpop.f32.mrf.mxu1 }
 0x68f   : > { %v2996_v56 = vld [vmem:[#allocation2 + $0x210] sm:$0xf] }
 0x690   : > { %v1258_v57 = vrot.slane %v1257_v55, 1 }
 0x692   : > { %v1259_v59 = vadd.f32 %v1258_v57, %v1257_v55  ;;  %v3479_v57 = vld [vmem:[#allocation2 + $0x214] sm:$0xf0] }
 0x694   : > { %v1267_v60 = vmul.f32 %v1266_v58, %v1259_v59  ;;  %v3009_v58 = vld [vmem:[#allocation2 + $0x240] sm:$0xf]  ;;  %v2997_v59 = vor.u32 %v3479_v57, %v2996_v56 }
 0x696   : > { %v1268_v61 = vpack.c.bf16 %v1267_v60, %v1267_v60  ;;  %v3482_v60 = vld [vmem:[#allocation2 + $0x244] sm:$0xf0]  ;;  %1459 = vmatpush.bf16.msrb.mxu0 %v2997_v59 }
 0x697   : > { %v3010_v63 = vor.u32 %v3482_v60, %v3009_v58 }
 0x698   : > { %2970 = vmatmul.msk.bf16.vlgmr.msrb.gmra.mxu2 %vm582_vm6, %v1268_v61  ;;  %v3030_v61 = vld [vmem:[#allocation2 + $0x290] sm:$0xf] }
 0x699   : > { %v3031_v2 = vor.u32 %v3487_v62, %v3030_v61  ;;  %1500 = vmatpush.bf16.msra.mxu1 %v3010_v63 }
 0x69a   : > { %1460 = vmatpush.bf16.msrb.mxu0 %v2993_v6 }
 0x69b   : > { %1540 = vmatpush.bf16.msra.mxu2 %v3031_v2 }
 0x69e   : > { %1628 = vmatpush.bf16.msra.mxu0 %v3061_v24  ;;  %v3495_v24 = vld [vmem:[#allocation2 + $0x314] sm:$0xf0] }
 0x71b   : > { %v1305_v13 = vpop.f32.mrf.mxu2 }
 0x71c   : > { %v1306_v14 = vadd.f32 %v1305_v13, %v1094_v11  ;;  %v2989_v11 = vsel %vm329_vm2, 1.0, %v3832_v19  ;;  %vm1554_vm2 = vcmask 64512  }
 0x71e   : > { %v2971_v15 = vmul.f32 -1.442695, %v1306_v14 }
 0x720   : > { %3674 = vpow2.f32 %v2971_v15 }
 0x723   : > { %v1307_v30 = vpop.f32.mrf.mxu2 }
 0x724   : > { %v1415_v30 = vld [vmem:[#allocation5 + $0x90] ss:$0 sm:$0xff] }
 0x726   : > { %v3675_v39 = vpop.eup %3674 }
 0x727   : > { %v1312_v40 = vadd.f32 1.0, %v3675_v39 }
 0x729   : > { %3676 = vrcp.f32 %v1312_v40  ;;  %v1324_v48 = vand.u32 2147483648, %v1312_v40  ;;  %v1322_v43 = vand.u32 2147483647, %v1312_v40  ;;  %vm1318_vm15 = vweird.f32 %v1312_v40 }
 0x72b   : > { %v1325_v51 = vor.u32 1.1754944e-38, %v1324_v48  ;;  %vm1323_vm5 = vcmp.eq.f32.partialorder %v1322_v43, 8.507059e+37  ;;  %v3492_v48 = vld [vmem:[#allocation2 + $0x2e4] sm:$0xf0]  ;;  %v3048_v43 = vld [vmem:[#allocation2 + $0x2d0] sm:$0xf] }
 0x72f   : > { %v3677_v42 = vpop.eup %3676 }
 0x730   : > { %v1314_v44 = vmul.f32 %v3677_v42, %v1312_v40  ;;  %vm1319_vm13 = vweird.f32 %v3677_v42  ;;  %v1552_v40 = vld [vmem:[#allocation2 + $0x690] sm:$0x3] }
 0x731   : > { %vm1320_vm4 = vmor %vm1318_vm15, %vm1319_vm13  ;;  %vm1791_vm13 = vcmp.lt.s32.totalorder %v3941_v1, 3 }
 0x732   : > { %v1315_v46 = vsub.f32 1.0, %v1314_v44 }
 0x734   : > { %v1316_v49 = vmul.f32 %v3677_v42, %v1315_v46  ;;  %v3052_v46 = vld [vmem:[#allocation2 + $0x2e0] sm:$0xf] }
 0x736   : > { %v1317_v50 = vadd.f32 %v3677_v42, %v1316_v49  ;;  %v3053_v49 = vor.u32 %v3492_v48, %v3052_v46  ;;  %v3515_v46 = vld [vmem:[#allocation2 + $0x3d4] sm:$0xf0]  ;;  %v3514_v48 = vld [vmem:[#allocation2 + $0x3d4] sm:$0xf] }
 0x738   : > { %v1321_v45 = vsel %vm1320_vm4, %v3677_v42, %v1317_v50  ;;  %v3493_v42 = vld [vmem:[#allocation2 + $0x2f4] sm:$0xf0] }
 0x739   : > { %v1326_v52 = vsel %vm1323_vm5, %v1325_v51, %v1321_v45  ;;  %v3057_v44 = vor.u32 %v3493_v42, %v3056_v41  ;;  %v3491_v50 = vld [vmem:[#allocation2 + $0x2d4] sm:$0xf0]  ;;  %v3044_v45 = vld [vmem:[#allocation2 + $0x2c0] sm:$0xf] }
 0x73a   : > { %v1328_v53 = vperm.slane %v1326_v52, 0  ;;  %v3049_v51 = vor.u32 %v3491_v50, %v3048_v43  ;;  %v3490_v52 = vld [vmem:[#allocation2 + $0x2c4] sm:$0xf0]  ;;  %v3120_v43 = vld [vmem:[#allocation2 + $0x3a0] sm:$0xf] }
 0x73b   : > { %1629 = vmatpush.bf16.msra.mxu0 %v3057_v44  ;;  %v3146_v44 = vld [vmem:[#allocation2 + $0x3d0] sm:$0xf]  ;;  %v3509_v50 = vld [vmem:[#allocation2 + $0x3a4] sm:$0xf0] }
 0x73c   : > { %v1329_v54 = vmul.f32 %v1328_v53, %v4106_v47  ;;  %v3486_v47 = vld [vmem:[#allocation2 + $0x284] sm:$0xf0]  ;;  %v3045_v53 = vor.u32 %v3490_v52, %v3044_v45  ;;  %v3121_v45 = vor.u32 %v3509_v50, %v3120_v43  ;;  %v3508_v52 = vld [vmem:[#allocation2 + $0x3a4] sm:$0xf] }
 0x73d   : > { %v3027_v7 = vor.u32 %v3486_v47, %v3026_v5 }
 0x73e   : > { %v1330_v55 = vpack.c.bf16 %v1329_v54, %v1329_v54  ;;  %v3836_v54 = vmov 4.0  }
 0x73f   : > { %1541 = vmatpush.bf16.msra.mxu2 %v3027_v7  ;;  %1630 = vmatpush.bf16.msra.mxu0 %v3053_v49  ;;  %3678 = vrcp.f32 %v3836_v54  ;;  %v3148_v49 = vld [vmem:[#allocation2 + $0x3d8] sm:$0xf0] }
 0x740   : > { %2988 = vmatmul.msk.bf16.vlgmr.msrb.gmra.mxu3 %vm582_vm6, %v1330_v55 }
 0x743   : > { %1631 = vmatpush.bf16.msra.mxu0 %v3049_v51  ;;  %1864 = vmatpush.bf16.msrb.mxu2 %v3121_v45  ;;  %v3206_v45 = vld [vmem:[#allocation2 + $0x448] sm:$0xf0] }
 0x745   : > { %v3679_v55 = vpop.eup %3678 }
 0x746   : > { %v1583_v56 = vmul.f32 4.0, %v3679_v55 }
 0x747   : > { %1632 = vmatpush.bf16.msra.mxu0 %v3045_v53  ;;  %v3122_v53 = vld [vmem:[#allocation2 + $0x3a8] sm:$0xf0] }
 0x748   : > { %v1584_v57 = vsub.f32 1.0, %v1583_v56  ;;  %v3125_v56 = vor.u32 %v3508_v52, %v3122_v53  ;;  %v3196_v53 = vld [vmem:[#allocation2 + $0x430] sm:$0xf] }
 0x74a   : > { %v1585_v61 = vmul.f32 %v3679_v55, %v1584_v57  ;;  %v3151_v57 = vor.u32 %v3514_v48, %v3148_v49  ;;  %v3204_v48 = vld [vmem:[#allocation2 + $0x440] sm:$0xf]  ;;  %v3529_v49 = vld [vmem:[#allocation2 + $0x444] sm:$0xf0] }
 0x74b   : > { %v3205_v50 = vor.u32 %v3529_v49, %v3204_v48  ;;  %v3545_v48 = vld [vmem:[#allocation2 + $0x4c4] sm:$0xf0] }
 0x74c   : > { %v1586_v2 = vadd.f32 %v3679_v55, %v1585_v61  ;;  %v3512_v61 = vld [vmem:[#allocation2 + $0x3c4] sm:$0xf] }
 0x7c3   : > { %v1367_v9 = vpop.f32.mrf.mxu3 }
 0x7c4   : > { %v1368_v10 = vadd.f32 %v1367_v9, %v1095_v8  ;;  %v3082_v9 = vld [vmem:[#allocation2 + $0x350] sm:$0xf] }
 0x7c6   : > { %v1418_v12 = vrot.slane %v1368_v10, 7  ;;  %v1420_v13 = vrot.slane %v1368_v10, 1  ;;  %v1424_v14 = vpack.c.bf16 %v1368_v10, %v1368_v10  ;;  %v3499_v10 = vld [vmem:[#allocation2 + $0x354] sm:$0xf0] }
 0x7c8   : > { %v1419_v15 = vmul.f32 %v3967_v20, %v1418_v12  ;;  %v1423_v16 = vmul.f32 %v2989_v11, %v1420_v13  ;;  %3023 = vmatmul.msk.bf16.vlgmr.msra.gmra.mxu1 %vm582_vm6, %v1424_v14  ;;  %v3083_v11 = vor.u32 %v3499_v10, %v3082_v9  ;;  %v3078_v12 = vld [vmem:[#allocation2 + $0x340] sm:$0xf]  ;;  %v3498_v13 = vld [vmem:[#allocation2 + $0x344] sm:$0xf0] }
 0x7c9   : > { %v3079_v14 = vor.u32 %v3498_v13, %v3078_v12 }
 0x7ca   : > { %v1425_v17 = vpack.c.bf16 %v1419_v15, %v1419_v15  ;;  %v1506_v18 = vpack.c.bf16 %v1423_v16, %v1423_v16  ;;  %1696 = vmatpush.bf16.msrb.mxu1 %v3083_v11  ;;  %v3074_v15 = vld [vmem:[#allocation2 + $0x330] sm:$0xf]  ;;  %v3497_v16 = vld [vmem:[#allocation2 + $0x334] sm:$0xf0] }
 0x7cb   : > { %v1369_v21 = vpop.f32.mrf.mxu3 }
 0x7cc   : > { %3006 = vmatmul.msk.bf16.vlgmr.msrb.gmra.mxu0 %vm582_vm6, %v1425_v17  ;;  %3040 = vmatmul.msk.bf16.vlgmr.msra.gmra.mxu2 %vm582_vm6, %v1506_v18  ;;  %vm1574_vm6 = vcmask 650240   ;;  %v3075_v17 = vor.u32 %v3497_v16, %v3074_v15  ;;  %v3070_v18 = vld [vmem:[#allocation2 + $0x320] sm:$0xf]  ;;  %v3496_v21 = vld [vmem:[#allocation2 + $0x324] sm:$0xf0] }
 0x7cd   : > { %v3071_v23 = vor.u32 %v3496_v21, %v3070_v18  ;;  %v3130_v15 = vld [vmem:[#allocation2 + $0x3b0] sm:$0xf]  ;;  %v3511_v16 = vld [vmem:[#allocation2 + $0x3b4] sm:$0xf0]  ;;  %v3132_v21 = vld [vmem:[#allocation2 + $0x3b8] sm:$0xf0] }
 0x7ce   : > { %1697 = vmatpush.bf16.msrb.mxu1 %v3079_v14  ;;  %v3131_v18 = vor.u32 %v3511_v16, %v3130_v15  ;;  %v1417_v15 = vld [vmem:[#allocation5 + $0xb0] ss:$0 sm:$0xff] }
 0x7d2   : > { %1698 = vmatpush.bf16.msrb.mxu1 %v3075_v17  ;;  %v3510_v17 = vld [vmem:[#allocation2 + $0x3b4] sm:$0xf] }
 0x7d6   : > { %1699 = vmatpush.bf16.msrb.mxu1 %v3071_v23  ;;  %v3507_v23 = vld [vmem:[#allocation2 + $0x394] sm:$0xf0] }
 0x845   : > { %v1502_v25 = vpop.f32.mrf.mxu1 }
 0x849   : > { %v1462_v26 = vpop.f32.mrf.mxu0 }
 0x84a   : > { %v1503_v28 = vadd.f32 %v1502_v25, %v1462_v26  ;;  %v1416_v25 = vld [vmem:[#allocation5 + $0xa0] ss:$0 sm:$0xff]  ;;  %v3067_v26 = vor.u32 %v3495_v24, %v3066_v22  ;;  %v3135_v24 = vor.u32 %v3510_v17, %v3132_v21 }
 0x84b   : > { %v3112_v22 = vld [vmem:[#allocation2 + $0x390] sm:$0xf] }
 0x84c   : > { %1700 = vmatpush.bf16.msrb.mxu1 %v3067_v26  ;;  %v3506_v26 = vld [vmem:[#allocation2 + $0x394] sm:$0xf] }
 0x84d   : > { %v1504_v27 = vpop.f32.mrf.mxu1 }
 0x84f   : > { %v1543_v31 = vpop.f32.mrf.mxu2 }
 0x850   : > { %v1547_v33 = vadd.f32 %v1543_v31, %v1503_v28  ;;  %v3162_v31 = vld [vmem:[#allocation2 + $0x3f0] sm:$0xf] }
 0x851   : > { %v1464_v29 = vpop.f32.mrf.mxu0 }
 0x852   : > { %v1548_v32 = vadd.f32 %v1547_v33, %v1415_v30  ;;  %v3519_v33 = vld [vmem:[#allocation2 + $0x3f4] sm:$0xf0]  ;;  %v3518_v29 = vld [vmem:[#allocation2 + $0x3f4] sm:$0xf] }
 0x854   : > { %v1549_v34 = vmax.f32 %v1548_v32, 0.0  ;;  %v3163_v32 = vor.u32 %v3519_v33, %v3162_v31  ;;  %v3504_v31 = vld [vmem:[#allocation2 + $0x384] sm:$0xf] }
 0x856   : > { %v1550_v35 = vrot.slane %v1549_v34, 1  ;;  %1943 = vmatpush.bf16.msrb.mxu0 %v3163_v32 }
 0x857   : > { %v1545_v36 = vpop.f32.mrf.mxu2 }
 0x858   : > { %v1551_v37 = vmax.f32 %v1549_v34, %v1550_v35  ;;  %v3164_v34 = vld [vmem:[#allocation2 + $0x3f8] sm:$0xf0]  ;;  %v3154_v35 = vld [vmem:[#allocation2 + $0x3e0] sm:$0xf]  ;;  %v3517_v36 = vld [vmem:[#allocation2 + $0x3e4] sm:$0xf0] }
 0x859   : > { %v3155_v41 = vor.u32 %v3517_v36, %v3154_v35  ;;  %v3503_v35 = vld [vmem:[#allocation2 + $0x374] sm:$0xf0]  ;;  %v3502_v36 = vld [vmem:[#allocation2 + $0x374] sm:$0xf] }
 0x85a   : > { %v1553_v38 = vpack.c.bf16 %v1551_v37, %v1551_v37  ;;  %v3167_v37 = vor.u32 %v3518_v29, %v3164_v34  ;;  %v3106_v29 = vld [vmem:[#allocation2 + $0x388] sm:$0xf0]  ;;  %v3096_v34 = vld [vmem:[#allocation2 + $0x370] sm:$0xf] }
 0x85b   : > { %1944 = vmatpush.bf16.msrb.mxu0 %v3155_v41  ;;  %v3109_v32 = vor.u32 %v3504_v31, %v3106_v29  ;;  %v3501_v41 = vld [vmem:[#allocation2 + $0x364] sm:$0xf0] }
 0x85c   : > { %v1559_v39 = vsel %vm987_vm14, %v1553_v38, 0  ;;  %vm1587_vm14 = vweird.f32 %v3679_v55  ;;  %v3516_v38 = vld [vmem:[#allocation2 + $0x3e4] sm:$0xf]  ;;  %1956 = vmatpush.bf16.msra.mxu1 %v3167_v37  ;;  %v3097_v37 = vor.u32 %v3503_v35, %v3096_v34 }
 0x85d   : > { %1568 = vmatpush.bf16.msra.mxu3 %v1559_v39  ;;  %v1588_v6 = vsel %vm1587_vm14, %v3679_v55, %v1586_v2  ;;  %v3156_v39 = vld [vmem:[#allocation2 + $0x3e8] sm:$0xf0]  ;;  %v3147_v55 = vor.u32 %v3515_v46, %v3146_v44 }
 0x85e   : > { %v3159_v42 = vor.u32 %v3516_v38, %v3156_v39  ;;  %v3098_v38 = vld [vmem:[#allocation2 + $0x378] sm:$0xf0]  ;;  %v3090_v46 = vld [vmem:[#allocation2 + $0x368] sm:$0xf0] }
 0x85f   : > { %1945 = vmatpush.bf16.msrb.mxu0 %v3147_v55  ;;  %v3101_v39 = vor.u32 %v3502_v36, %v3098_v38  ;;  %v3526_v55 = vld [vmem:[#allocation2 + $0x434] sm:$0xf] }
 0x860   : > { %3041 = vmatmul.msk.bf16.vlgmr.msra.gmra.mxu3 %vm1554_vm2, %v1552_v40  ;;  %1957 = vmatpush.bf16.msra.mxu1 %v3159_v42  ;;  %v3500_v42 = vld [vmem:[#allocation2 + $0x364] sm:$0xf] }
 0x861   : > { %1877 = vmatpush.bf16.msrb.mxu3 %v3125_v56  ;;  %v3093_v43 = vor.u32 %v3500_v42, %v3090_v46  ;;  %v3272_v46 = vld [vmem:[#allocation2 + $0x4c0] sm:$0xf] }
 0x864   : > { %1958 = vmatpush.bf16.msra.mxu1 %v3151_v57  ;;  %v3198_v57 = vld [vmem:[#allocation2 + $0x438] sm:$0xf0] }
 0x8e3   : > { %v4121_v58 = vpop.f32.mrf.mxu3 }
 0x8e4   : > { %v1575_v59 = vsel %vm1574_vm6, %v4121_v58, 0.0 }
 0x8e5   : > { %v1576_v60 = vrot.slane %v1575_v59, 4 }
 0x8e7   : > { %v1577_v62 = vadd.f32 %v1576_v60, %v1575_v59  ;;  %v3138_v59 = vld [vmem:[#allocation2 + $0x3c0] sm:$0xf]  ;;  %v3513_v60 = vld [vmem:[#allocation2 + $0x3c4] sm:$0xf0] }
 0x8e9   : > { %v1578_v63 = vrot.slane %v1577_v62, 2 }
 0x8eb   : > { %v1579_v3 = vadd.f32 %v1578_v63, %v1577_v62  ;;  %v1572_v4 = vpop.f32.mrf.mxu3  ;;  %v3140_v62 = vld [vmem:[#allocation2 + $0x3c8] sm:$0xf0]  ;;  %v3139_v63 = vor.u32 %v3513_v60, %v3138_v59  ;;  %v3201_v59 = vor.u32 %v3526_v55, %v3198_v57  ;;  %v3188_v60 = vld [vmem:[#allocation2 + $0x420] sm:$0xf] }
 0x8ec   : > { %v3143_v2 = vor.u32 %v3512_v61, %v3140_v62  ;;  %v3525_v61 = vld [vmem:[#allocation2 + $0x424] sm:$0xf0]  ;;  %v3524_v62 = vld [vmem:[#allocation2 + $0x424] sm:$0xf] }
 0x8ed   : > { %v1580_v5 = vrot.slane %v1579_v3, 1  ;;  %1946 = vmatpush.bf16.msrb.mxu0 %v3139_v63  ;;  %v3189_v63 = vor.u32 %v3525_v61, %v3188_v60  ;;  %v1777_v55 = vld [vmem:[#allocation5 + $0xc0] ss:$8 sm:$0x3] }
 0x8ee   : > { %1959 = vmatpush.bf16.msra.mxu1 %v3143_v2  ;;  %v3190_v2 = vld [vmem:[#allocation2 + $0x428] sm:$0xf0]  ;;  %v2056_v60 = vperm.slane %v1777_v55, 0  ;;  %v2057_v61 = vperm.slane %v1777_v55, 1 }
 0x8ef   : > { %v1581_v47 = vadd.f32 %v1580_v5, %v1579_v3 }
 0x8f1   : > { %v1589_v7 = vmul.f32 %v1588_v6, %v1581_v47  ;;  %1947 = vmatpush.bf16.msrb.mxu0 %v3131_v18 }
 0x8f2   : > { %1960 = vmatpush.bf16.msra.mxu1 %v3135_v24 }
 0x8f3   : > { %v1590_v8 = vpack.c.bf16 %v1589_v7, %v1589_v7 }
 0x8f5   : > { %3062 = vmatmul.msk.bf16.vlgmr.msra.gmra.mxu0 %vm1621_vm8, %v1590_v8 }
 0x972   : > { %v1634_v27 = vpop.f32.mrf.mxu0 }
 0x973   : > { %v1635_v28 = vadd.f32 %v1634_v27, %v1416_v25  ;;  %v3113_v25 = vor.u32 %v3507_v23, %v3112_v22  ;;  %v3114_v27 = vld [vmem:[#allocation2 + $0x398] sm:$0xf0]  ;;  %v1788_v23 = vrot.slane %v3967_v20, 5 }
 0x975   : > { %v3063_v30 = vmul.f32 -1.442695, %v1635_v28  ;;  %v3117_v28 = vor.u32 %v3506_v26, %v3114_v27  ;;  %1865 = vmatpush.bf16.msrb.mxu2 %v3113_v25 }
 0x977   : > { %3680 = vpow2.f32 %v3063_v30  ;;  %1878 = vmatpush.bf16.msrb.mxu3 %v3117_v28  ;;  %v3505_v30 = vld [vmem:[#allocation2 + $0x384] sm:$0xf0]  ;;  %v3085_v28 = vsel %vm1791_vm13, 1.0, %v3832_v19 }
 0x97a   : > { %v1636_v40 = vpop.f32.mrf.mxu0 }
 0x97b   : > { %1879 = vmatpush.bf16.msrb.mxu3 %v3109_v32  ;;  %v3088_v40 = vld [vmem:[#allocation2 + $0x360] sm:$0xf] }
 0x97c   : > { %v3089_v44 = vor.u32 %v3501_v41, %v3088_v40 }
 0x97d   : > { %v3681_v51 = vpop.eup %3680 }
 0x97e   : > { %v1641_v54 = vadd.f32 1.0, %v3681_v51  ;;  %v3528_v51 = vld [vmem:[#allocation2 + $0x444] sm:$0xf] }
 0x97f   : > { %1880 = vmatpush.bf16.msrb.mxu3 %v3101_v39  ;;  %v3209_v52 = vor.u32 %v3528_v51, %v3206_v45  ;;  %v3264_v51 = vld [vmem:[#allocation2 + $0x4b0] sm:$0xf]  ;;  %v3543_v45 = vld [vmem:[#allocation2 + $0x4b4] sm:$0xf0] }
 0x980   : > { %3682 = vrcp.f32 %v1641_v54  ;;  %v1653_v6 = vand.u32 2147483648, %v1641_v54  ;;  %v1651_v7 = vand.u32 2147483647, %v1641_v54  ;;  %vm1647_vm10 = vweird.f32 %v1641_v54 }
 0x982   : > { %v1654_v9 = vor.u32 1.1754944e-38, %v1653_v6  ;;  %vm1652_vm3 = vcmp.eq.f32.partialorder %v1651_v7, 8.507059e+37  ;;  %v3522_v6 = vld [vmem:[#allocation2 + $0x414] sm:$0xf] }
 0x983   : > { %1881 = vmatpush.bf16.msrb.mxu3 %v3093_v43 }
 0x986   : > { %v3683_v3 = vpop.eup %3682 }
 0x987   : > { %v1643_v4 = vmul.f32 %v3683_v3, %v1641_v54  ;;  %vm1648_vm9 = vweird.f32 %v3683_v3  ;;  %2043 = vmatpush.bf16.msra.mxu3 %v3209_v52  ;;  %v3527_v54 = vld [vmem:[#allocation2 + $0x434] sm:$0xf0]  ;;  %v3265_v52 = vor.u32 %v3543_v45, %v3264_v51  ;;  %v3234_v51 = vld [vmem:[#allocation2 + $0x478] sm:$0xf0] }
 0x988   : > { %vm1649_vm11 = vmor %vm1647_vm10, %vm1648_vm9  ;;  %v3197_v56 = vor.u32 %v3527_v54, %v3196_v53  ;;  %v3256_v53 = vld [vmem:[#allocation2 + $0x4a0] sm:$0xf]  ;;  %v3541_v54 = vld [vmem:[#allocation2 + $0x4a4] sm:$0xf0] }
 0x989   : > { %v1644_v5 = vsub.f32 1.0, %v1643_v4  ;;  %v3180_v4 = vld [vmem:[#allocation2 + $0x410] sm:$0xf] }
 0x98b   : > { %v1645_v47 = vmul.f32 %v3683_v3, %v1644_v5  ;;  %2044 = vmatpush.bf16.msra.mxu3 %v3201_v59  ;;  %v3523_v5 = vld [vmem:[#allocation2 + $0x414] sm:$0xf0] }
 0x98c   : > { %v3181_v7 = vor.u32 %v3523_v5, %v3180_v4 }
 0x98d   : > { %v1646_v8 = vadd.f32 %v3683_v3, %v1645_v47  ;;  %v3182_v47 = vld [vmem:[#allocation2 + $0x418] sm:$0xf0] }
 0x98f   : > { %v1650_v10 = vsel %vm1649_vm11, %v3683_v3, %v1646_v8  ;;  %v3193_v3 = vor.u32 %v3524_v62, %v3190_v2  ;;  %v3185_v8 = vor.u32 %v3522_v6, %v3182_v47  ;;  %v3248_v62 = vld [vmem:[#allocation2 + $0x490] sm:$0xf] }
 0x990   : > { %v1655_v11 = vsel %vm1652_vm3, %v1654_v9, %v1650_v10  ;;  %v3172_v9 = vld [vmem:[#allocation2 + $0x400] sm:$0xf]  ;;  %v3521_v10 = vld [vmem:[#allocation2 + $0x404] sm:$0xf0] }
 0x991   : > { %v1657_v12 = vperm.slane %v1655_v11, 0  ;;  %2045 = vmatpush.bf16.msra.mxu3 %v3193_v3  ;;  %v3520_v11 = vld [vmem:[#allocation2 + $0x404] sm:$0xf] }
 0x993   : > { %v1658_v13 = vmul.f32 %v1657_v12, %v4121_v58  ;;  %v3104_v58 = vld [vmem:[#allocation2 + $0x380] sm:$0xf]  ;;  %v3174_v12 = vld [vmem:[#allocation2 + $0x408] sm:$0xf0] }
 0x994   : > { %v3105_v33 = vor.u32 %v3505_v30, %v3104_v58  ;;  %v1795_v30 = vrot.slane %v3085_v28, 7 }
 0x995   : > { %v1659_v14 = vpack.c.bf16 %v1658_v13, %v1658_v13  ;;  %v3173_v13 = vor.u32 %v3521_v10, %v3172_v9  ;;  %2046 = vmatpush.bf16.msra.mxu3 %v3185_v8 }
 0x996   : > { %1866 = vmatpush.bf16.msrb.mxu2 %v3105_v33 }
 0x997   : > { %3084 = vmatmul.msk.bf16.vlgmr.msrb.gmra.mxu1 %vm1621_vm8, %v1659_v14  ;;  %v3177_v14 = vor.u32 %v3520_v11, %v3174_v12 }
 0x999   : > { %2047 = vmatpush.bf16.msra.mxu3 %v3177_v14 }
 0x99a   : > { %1867 = vmatpush.bf16.msrb.mxu2 %v3097_v37 }
 0x99e   : > { %1868 = vmatpush.bf16.msrb.mxu2 %v3089_v44 }
 0x9a2   : > { %2030 = vmatpush.bf16.msra.mxu2 %v3205_v50  ;;  %v3273_v50 = vor.u32 %v3545_v48, %v3272_v46  ;;  %v3232_v48 = vld [vmem:[#allocation2 + $0x470] sm:$0xf] }
 0x9a6   : > { %2031 = vmatpush.bf16.msra.mxu2 %v3197_v56  ;;  %v3257_v56 = vor.u32 %v3541_v54, %v3256_v53  ;;  %v3533_v53 = vld [vmem:[#allocation2 + $0x464] sm:$0xf0]  ;;  %v3532_v54 = vld [vmem:[#allocation2 + $0x464] sm:$0xf] }
 0x9aa   : > { %2032 = vmatpush.bf16.msra.mxu2 %v3189_v63  ;;  %v3539_v63 = vld [vmem:[#allocation2 + $0x494] sm:$0xf0] }
 0x9ab   : > { %v3249_v6 = vor.u32 %v3539_v63, %v3248_v62  ;;  %v3548_v62 = vld [vmem:[#allocation2 + $0x4e4] sm:$0xf]  ;;  %v3290_v63 = vld [vmem:[#allocation2 + $0x4e8] sm:$0xf0] }
 0x9ae   : > { %2033 = vmatpush.bf16.msra.mxu2 %v3181_v7 }
 0x9b2   : > { %2034 = vmatpush.bf16.msra.mxu2 %v3173_v13 }
 0xa14   : > { %v1702_v16 = vpop.f32.mrf.mxu1 }
 0xa15   : > { %v1703_v17 = vadd.f32 %v1702_v16, %v1417_v15 }
 0xa17   : > { %v1783_v18 = vrot.slane %v1703_v17, 4  ;;  %v1798_v21 = vpack.c.bf16 %v1703_v17, %v1703_v17 }
 0xa19   : > { %v1784_v22 = vsel %vm1782_vm12, %v1783_v18, %v1703_v17  ;;  %3168 = vmatmul.msk.bf16.vlgmr.msrb.gmra.mxu0 %vm1621_vm8, %v1798_v21  ;;  %3169 = vmatmul.msk.bf16.vlgmr.msra.gmra.mxu1 %vm1621_vm8, %v1798_v21 }
 0xa1a   : > { %v1785_v24 = vrot.slane %v1784_v22, 4 }
 0xa1c   : > { %v1786_v25 = vsel %vm1782_vm12, %v1785_v24, %v1703_v17  ;;  %v1704_v26 = vpop.f32.mrf.mxu1  ;;  %v3544_v24 = vld [vmem:[#allocation2 + $0x4c4] sm:$0xf] }
 0xa1d   : > { %v1790_v27 = vmul.f32 %v1788_v23, %v1786_v25  ;;  %v1797_v20 = vmul.f32 %v1795_v30, %v1786_v25  ;;  %v3274_v25 = vld [vmem:[#allocation2 + $0x4c8] sm:$0xf0] }
 0xa1e   : > { %v3277_v30 = vor.u32 %v3544_v24, %v3274_v25 }
 0xa1f   : > { %v1799_v58 = vpack.c.bf16 %v1790_v27, %v1790_v27  ;;  %v1966_v35 = vpack.c.bf16 %v1797_v20, %v1797_v20  ;;  %v2080_v20 = vld [vmem:[#allocation2 + $0x690] sm:$0x1] }
 0xa21   : > { %v1801_v31 = vshrl.u32 %v1799_v58, 16  ;;  %v1804_v33 = vshll.u32 %v1799_v58, 16  ;;  %v1970_v1 = vshll.u32 %v1966_v35, 16  ;;  %v1968_v37 = vshrl.u32 %v1966_v35, 16  ;;  %v3540_v35 = vld [vmem:[#allocation2 + $0x4a4] sm:$0xf] }
 0xa23   : > { %v1803_v29 = vrot.slane %v1801_v31, 1  ;;  %v1806_v32 = vrot.slane %v1804_v33, 2  ;;  %v1972_v36 = vrot.slane %v1970_v1, 1  ;;  %v3542_v31 = vld [vmem:[#allocation2 + $0x4b4] sm:$0xf] }
 0xa24   : > { %v3266_v33 = vld [vmem:[#allocation2 + $0x4b8] sm:$0xf0]  ;;  %v3258_v1 = vld [vmem:[#allocation2 + $0x4a8] sm:$0xf0] }
 0xa25   : > { %v1807_v34 = vor.u32 %v1806_v32, %v1803_v29  ;;  %v1973_v38 = vor.u32 %v1972_v36, %v1968_v37  ;;  %v3261_v36 = vor.u32 %v3540_v35, %v3258_v1  ;;  %v3538_v37 = vld [vmem:[#allocation2 + $0x494] sm:$0xf] }
 0xa27   : > { %3126 = vmatmul.msk.bf16.vlgmr.msrb.gmra.mxu2 %vm1621_vm8, %v1807_v34  ;;  %3127 = vmatmul.msk.bf16.vlgmr.msrb.gmra.mxu3 %vm1621_vm8, %v1807_v34  ;;  %v3269_v34 = vor.u32 %v3542_v31, %v3266_v33 }
 0xa28   : > { %2252 = vmatpush.bf16.msrb.mxu2 %v3273_v50 }
 0xa2c   : > { %2253 = vmatpush.bf16.msrb.mxu2 %v3265_v52  ;;  %v3224_v52 = vld [vmem:[#allocation2 + $0x460] sm:$0xf] }
 0xa2d   : > { %v3225_v55 = vor.u32 %v3533_v53, %v3224_v52  ;;  %v3350_v52 = vld [vmem:[#allocation2 + $0x558] sm:$0xf0] }
 0xa30   : > { %2254 = vmatpush.bf16.msrb.mxu2 %v3257_v56  ;;  %v3226_v56 = vld [vmem:[#allocation2 + $0x468] sm:$0xf0] }
 0xa34   : > { %2255 = vmatpush.bf16.msrb.mxu2 %v3249_v6 }
 0xa37   : > { %3210 = vmatmul.msk.bf16.vlgmr.msra.gmra.mxu2 %vm1621_vm8, %v1973_v38  ;;  %3211 = vmatmul.msk.bf16.vlgmr.msra.gmra.mxu3 %vm1621_vm8, %v1973_v38  ;;  %v3250_v38 = vld [vmem:[#allocation2 + $0x498] sm:$0xf0] }
 0xa96   : > { %v1949_v19 = vpop.f32.mrf.mxu0  ;;  %v1962_v39 = vpop.f32.mrf.mxu1 }
 0xa9e   : > { %v1951_v40 = vpop.f32.mrf.mxu0  ;;  %v1964_v41 = vpop.f32.mrf.mxu1 }
 0xa9f   : > { %v3537_v40 = vld [vmem:[#allocation2 + $0x484] sm:$0xf0] }
 0xaaa   : > { %v1870_v42 = vpop.f32.mrf.mxu2  ;;  %v1883_v44 = vpop.f32.mrf.mxu3 }
 0xaab   : > { %v1950_v57 = vadd.f32 %v1949_v19, %v1870_v42  ;;  %v1963_v59 = vadd.f32 %v1962_v39, %v1883_v44  ;;  %v3253_v19 = vor.u32 %v3538_v37, %v3250_v38  ;;  %v3240_v39 = vld [vmem:[#allocation2 + $0x480] sm:$0xf]  ;;  %v3536_v42 = vld [vmem:[#allocation2 + $0x484] sm:$0xf]  ;;  %v3242_v44 = vld [vmem:[#allocation2 + $0x488] sm:$0xf0] }
 0xaac   : > { %v3241_v41 = vor.u32 %v3537_v40, %v3240_v39  ;;  %v3245_v46 = vor.u32 %v3536_v42, %v3242_v44  ;;  %v3565_v42 = vld [vmem:[#allocation2 + $0x564] sm:$0xf0]  ;;  %v3564_v44 = vld [vmem:[#allocation2 + $0x564] sm:$0xf] }
 0xaae   : > { %2256 = vmatpush.bf16.msrb.mxu2 %v3241_v41  ;;  %v3356_v41 = vld [vmem:[#allocation2 + $0x560] sm:$0xf] }
 0xab2   : > { %v1872_v49 = vpop.f32.mrf.mxu2  ;;  %v1885_v43 = vpop.f32.mrf.mxu3 }
 0xab3   : > { %v3535_v49 = vld [vmem:[#allocation2 + $0x474] sm:$0xf0]  ;;  %v3534_v43 = vld [vmem:[#allocation2 + $0x474] sm:$0xf] }
 0xab4   : > { %v3233_v50 = vor.u32 %v3535_v49, %v3232_v48  ;;  %v3237_v45 = vor.u32 %v3534_v43, %v3234_v51  ;;  %v3358_v48 = vld [vmem:[#allocation2 + $0x568] sm:$0xf0]  ;;  %v3348_v43 = vld [vmem:[#allocation2 + $0x550] sm:$0xf]  ;;  %v3562_v51 = vld [vmem:[#allocation2 + $0x554] sm:$0xf] }
 0xab5   : > { %v3361_v49 = vor.u32 %v3564_v44, %v3358_v48  ;;  %v3353_v53 = vor.u32 %v3562_v51, %v3350_v52  ;;  %v3302_v52 = vld [vmem:[#allocation2 + $0x4f8] sm:$0xf0] }
 0xab6   : > { %2257 = vmatpush.bf16.msrb.mxu2 %v3233_v50  ;;  %v3563_v50 = vld [vmem:[#allocation2 + $0x554] sm:$0xf0] }
 0xaba   : > { %v2036_v2 = vpop.f32.mrf.mxu2  ;;  %v2049_v3 = vpop.f32.mrf.mxu3  ;;  %2258 = vmatpush.bf16.msrb.mxu2 %v3225_v55  ;;  %v3561_v55 = vld [vmem:[#allocation2 + $0x544] sm:$0xf0] }
 0xabb   : > { %v2053_v4 = vadd.f32 %v2036_v2, %v1950_v57  ;;  %v2054_v5 = vadd.f32 %v2049_v3, %v1963_v59  ;;  %v3288_v57 = vld [vmem:[#allocation2 + $0x4e0] sm:$0xf]  ;;  %v3549_v59 = vld [vmem:[#allocation2 + $0x4e4] sm:$0xf0]  ;;  %v3293_v2 = vor.u32 %v3548_v62, %v3290_v63  ;;  %v3216_v3 = vld [vmem:[#allocation2 + $0x450] sm:$0xf] }
 0xabc   : > { %v3559_v62 = vld [vmem:[#allocation2 + $0x534] sm:$0xf0]  ;;  %v3558_v63 = vld [vmem:[#allocation2 + $0x534] sm:$0xf] }
 0xabd   : > { %v2060_v47 = vadd.f32 %v2056_v60, %v2053_v4  ;;  %v2061_v7 = vadd.f32 %v2057_v61, %v2054_v5  ;;  %v3229_v60 = vor.u32 %v3532_v54, %v3226_v56  ;;  %v3289_v61 = vor.u32 %v3549_v59, %v3288_v57  ;;  %v3531_v4 = vld [vmem:[#allocation2 + $0x454] sm:$0xf0]  ;;  %v3530_v5 = vld [vmem:[#allocation2 + $0x454] sm:$0xf]  ;;  %v3340_v54 = vld [vmem:[#allocation2 + $0x540] sm:$0xf] }
 0xabe   : > { %v3217_v6 = vor.u32 %v3531_v4, %v3216_v3  ;;  %v3560_v56 = vld [vmem:[#allocation2 + $0x544] sm:$0xf]  ;;  %v3341_v57 = vor.u32 %v3561_v55, %v3340_v54  ;;  %v3342_v59 = vld [vmem:[#allocation2 + $0x548] sm:$0xf0]  ;;  %v3334_v3 = vld [vmem:[#allocation2 + $0x538] sm:$0xf0] }
 0xabf   : > { %v2062_v8 = vmax.f32 %v2060_v47, 0.0  ;;  %v2063_v9 = vmax.f32 %v2061_v7, 0.0  ;;  %2271 = vmatpush.bf16.msrb.mxu3 %v3289_v61  ;;  %v3218_v47 = vld [vmem:[#allocation2 + $0x458] sm:$0xf0]  ;;  %v3280_v7 = vld [vmem:[#allocation2 + $0x4d0] sm:$0xf] }
 0xac0   : > { %2259 = vmatpush.bf16.msrb.mxu2 %v3217_v6  ;;  %v3332_v61 = vld [vmem:[#allocation2 + $0x530] sm:$0xf]  ;;  %v1779_v4 = vld [vmem:[#allocation5 + $0xd0] ss:$8 sm:$0x3] }
 0xac1   : > { %v2064_v10 = vrot.slane %v2062_v8, 4  ;;  %v2066_v11 = vrot.slane %v2063_v9, 4  ;;  %v3324_v6 = vld [vmem:[#allocation2 + $0x520] sm:$0xf] }
 0xac2   : > { %v2038_v12 = vpop.f32.mrf.mxu2  ;;  %v2051_v13 = vpop.f32.mrf.mxu3 }
 0xac3   : > { %v2065_v14 = vsel %vm1782_vm12, %v2064_v10, %v2062_v8  ;;  %v2067_v15 = vsel %vm1782_vm12, %v2066_v11, %v2063_v9  ;;  %v3546_v11 = vld [vmem:[#allocation2 + $0x4d4] sm:$0xf]  ;;  %v3282_v12 = vld [vmem:[#allocation2 + $0x4d8] sm:$0xf0] }
 0xac4   : > { %v2068_v16 = vrot.slane %v2065_v14, 4  ;;  %v2069_v17 = vrot.slane %v2067_v15, 4  ;;  %v3285_v13 = vor.u32 %v3546_v11, %v3282_v12  ;;  %v3837_v14 = vmov 2.0   ;;  %2482 = vmatpush.bf16.msra.mxu2 %v3361_v49  ;;  %v3372_v12 = vld [vmem:[#allocation2 + $0x580] sm:$0xf] }
 0xac5   : > { %3684 = vrcp.f32 %v3837_v14  ;;  %v3568_v14 = vld [vmem:[#allocation2 + $0x584] sm:$0xf]  ;;  %v3300_v49 = vld [vmem:[#allocation2 + $0x4f0] sm:$0xf] }
 0xac6   : > { %v2070_v18 = vsel %vm1782_vm12, %v2068_v16, %v2062_v8  ;;  %v2071_v21 = vsel %vm1782_vm12, %v2069_v17, %v2063_v9 }
 0xac7   : > { %v2074_v22 = vrot.slane %v2070_v18, 1  ;;  %v2075_v23 = vrot.slane %v2071_v21, 1 }
 0xac8   : > { %2483 = vmatpush.bf16.msra.mxu2 %v3353_v53 }
 0xac9   : > { %v2078_v26 = vmax.f32 %v2062_v8, %v2074_v22  ;;  %v2079_v27 = vmax.f32 %v2063_v9, %v2075_v23  ;;  %v3547_v8 = vld [vmem:[#allocation2 + $0x4d4] sm:$0xf0]  ;;  %v3221_v9 = vor.u32 %v3530_v5, %v3218_v47  ;;  %v3337_v5 = vor.u32 %v3558_v63, %v3334_v3  ;;  %v3557_v47 = vld [vmem:[#allocation2 + $0x524] sm:$0xf0] }
 0xaca   : > { %v3281_v10 = vor.u32 %v3547_v8, %v3280_v7  ;;  %v3556_v7 = vld [vmem:[#allocation2 + $0x524] sm:$0xf]  ;;  %v2246_v8 = vperm.slane %v1779_v4, 1 }
 0xacb   : > { %v2081_v28 = vpack.c.bf16 %v2078_v26, %v2078_v26  ;;  %v2082_v58 = vpack.c.bf16 %v2079_v27, %v2079_v27  ;;  %v3685_v15 = vpop.eup %3684 }
 0xacc   : > { %2272 = vmatpush.bf16.msrb.mxu3 %v3281_v10  ;;  %v2134_v16 = vmul.f32 2.0, %v3685_v15  ;;  %vm2138_vm15 = vweird.f32 %v3685_v15  ;;  %v3326_v10 = vld [vmem:[#allocation2 + $0x528] sm:$0xf0] }
 0xacd   : > { %v2087_v29 = vsel %vm391_vm0, %v2081_v28, 0  ;;  %v2090_v32 = vsel %vm391_vm0, %v2082_v58, 0  ;;  %v3329_v11 = vor.u32 %v3556_v7, %v3326_v10 }
 0xace   : > { %2099 = vmatpush.bf16.msra.mxu0 %v2087_v29  ;;  %2112 = vmatpush.bf16.msrb.mxu1 %v2090_v32  ;;  %v2135_v17 = vsub.f32 1.0, %v2134_v16 }
 0xad0   : > { %v2136_v26 = vmul.f32 %v3685_v15, %v2135_v17  ;;  %v3374_v17 = vld [vmem:[#allocation2 + $0x588] sm:$0xf0] }
 0xad1   : > { %3212 = vmatmul.msk.bf16.vlgmr.msra.gmra.mxu0 %vm378_vm1, %v2080_v20  ;;  %3213 = vmatmul.msk.bf16.vlgmr.msrb.gmra.mxu1 %vm378_vm1, %v2080_v20  ;;  %vm2125_vm1 = vcmask 254976  }
 0xad2   : > { %2278 = vmatpush.bf16.msrb.mxu0 %v3277_v30  ;;  %2297 = vmatpush.bf16.msra.mxu1 %v3293_v2  ;;  %v2137_v31 = vadd.f32 %v3685_v15, %v2136_v26  ;;  %v3333_v2 = vor.u32 %v3559_v62, %v3332_v61  ;;  %v3554_v26 = vld [vmem:[#allocation2 + $0x514] sm:$0xf] }
 0xad4   : > { %v4153_v1 = vsel %vm2138_vm15, %v3685_v15, %v2137_v31  ;;  %v2245_v15 = vperm.slane %v1779_v4, 0  ;;  %v3364_v31 = vld [vmem:[#allocation2 + $0x570] sm:$0xf] }
 0xad6   : > { %2279 = vmatpush.bf16.msrb.mxu0 %v3269_v34  ;;  %2298 = vmatpush.bf16.msra.mxu1 %v3285_v13  ;;  %v3569_v13 = vld [vmem:[#allocation2 + $0x584] sm:$0xf0] }
 0xad7   : > { %v3373_v16 = vor.u32 %v3569_v13, %v3372_v12 }
 0xada   : > { %2280 = vmatpush.bf16.msrb.mxu0 %v3261_v36  ;;  %2475 = vmatpush.bf16.msrb.mxu1 %v3373_v16 }
 0xade   : > { %2281 = vmatpush.bf16.msrb.mxu0 %v3253_v19 }
 0xae2   : > { %2282 = vmatpush.bf16.msrb.mxu0 %v3245_v46  ;;  %v3357_v46 = vor.u32 %v3565_v42, %v3356_v41 }
 0xae4   : > { %2456 = vmatpush.bf16.msra.mxu3 %v3357_v46 }
 0xae6   : > { %2283 = vmatpush.bf16.msrb.mxu0 %v3237_v45  ;;  %v3349_v45 = vor.u32 %v3563_v50, %v3348_v43  ;;  %v3551_v43 = vld [vmem:[#allocation2 + $0x4f4] sm:$0xf0]  ;;  %v3550_v50 = vld [vmem:[#allocation2 + $0x4f4] sm:$0xf] }
 0xae7   : > { %v3305_v54 = vor.u32 %v3550_v50, %v3302_v52  ;;  %v3582_v50 = vld [vmem:[#allocation2 + $0x654] sm:$0xf0]  ;;  %v3573_v52 = vld [vmem:[#allocation2 + $0x5c4] sm:$0xf0] }
 0xae8   : > { %2457 = vmatpush.bf16.msra.mxu3 %v3349_v45  ;;  %v3301_v45 = vor.u32 %v3551_v43, %v3300_v49  ;;  %v3430_v49 = vld [vmem:[#allocation2 + $0x650] sm:$0xf] }
 0xaea   : > { %2284 = vmatpush.bf16.msrb.mxu0 %v3229_v60  ;;  %v3345_v60 = vor.u32 %v3560_v56, %v3342_v59 }
 0xaec   : > { %2458 = vmatpush.bf16.msra.mxu3 %v3341_v57  ;;  %2484 = vmatpush.bf16.msra.mxu2 %v3345_v60 }
 0xaee   : > { %2285 = vmatpush.bf16.msrb.mxu0 %v3221_v9  ;;  %v3325_v9 = vor.u32 %v3557_v47, %v3324_v6 }
 0xaf0   : > { %2459 = vmatpush.bf16.msra.mxu3 %v3333_v2  ;;  %2485 = vmatpush.bf16.msra.mxu2 %v3337_v5 }
 0xaf4   : > { %2460 = vmatpush.bf16.msra.mxu3 %v3325_v9  ;;  %2486 = vmatpush.bf16.msra.mxu2 %v3329_v11 }
 0xb4e   : > { %v4146_v18 = vpop.f32.mrf.mxu0  ;;  %v4148_v21 = vpop.f32.mrf.mxu1 }
 0xb4f   : > { %v2118_v22 = vsel %vm391_vm0, %v4146_v18, 0.0  ;;  %v2126_v23 = vsel %vm2125_vm1, %v4148_v21, 0.0 }
 0xb50   : > { %v2119_v24 = vrot.slane %v2118_v22, 4  ;;  %v2127_v25 = vrot.slane %v2126_v23, 4 }
 0xb52   : > { %v2120_v27 = vadd.f32 %v2119_v24, %v2118_v22  ;;  %v2128_v28 = vadd.f32 %v2127_v25, %v2126_v23  ;;  %v3377_v23 = vor.u32 %v3568_v14, %v3374_v17  ;;  %v3316_v24 = vld [vmem:[#allocation2 + $0x510] sm:$0xf]  ;;  %v3555_v25 = vld [vmem:[#allocation2 + $0x514] sm:$0xf0] }
 0xb54   : > { %v2121_v58 = vrot.slane %v2120_v27, 2  ;;  %v2129_v30 = vrot.slane %v2128_v28, 2  ;;  %2501 = vmatpush.bf16.msra.mxu0 %v3377_v23 }
 0xb56   : > { %v2122_v33 = vadd.f32 %v2121_v58, %v2120_v27  ;;  %v2130_v29 = vadd.f32 %v2129_v30, %v2128_v28  ;;  %v2103_v32 = vpop.f32.mrf.mxu0  ;;  %v2116_v20 = vpop.f32.mrf.mxu1  ;;  %v3317_v58 = vor.u32 %v3555_v25, %v3316_v24  ;;  %v3318_v30 = vld [vmem:[#allocation2 + $0x518] sm:$0xf0] }
 0xb57   : > { %v3566_v20 = vld [vmem:[#allocation2 + $0x574] sm:$0xf] }
 0xb58   : > { %v2123_v34 = vrot.slane %v2122_v33, 1  ;;  %v2131_v35 = vrot.slane %v2130_v29, 1  ;;  %2461 = vmatpush.bf16.msra.mxu3 %v3317_v58 }
 0xb5a   : > { %v2124_v36 = vadd.f32 %v2123_v34, %v2122_v33  ;;  %v2132_v37 = vadd.f32 %v2131_v35, %v2130_v29  ;;  %v3567_v33 = vld [vmem:[#allocation2 + $0x574] sm:$0xf0]  ;;  %v3321_v29 = vor.u32 %v3554_v26, %v3318_v30  ;;  %v3366_v34 = vld [vmem:[#allocation2 + $0x578] sm:$0xf0]  ;;  %v3308_v35 = vld [vmem:[#allocation2 + $0x500] sm:$0xf] }
 0xb5b   : > { %v3365_v32 = vor.u32 %v3567_v33, %v3364_v31  ;;  %v3410_v31 = vld [vmem:[#allocation2 + $0x600] sm:$0xf] }
 0xb5c   : > { %v2141_v38 = vmul.f32 %v4153_v1, %v2132_v37  ;;  %v2140_v19 = vmul.f32 %v4153_v1, %v2124_v36  ;;  %v3369_v37 = vor.u32 %v3566_v20, %v3366_v34  ;;  %2487 = vmatpush.bf16.msra.mxu2 %v3321_v29  ;;  %v3442_v33 = vld [vmem:[#allocation2 + $0x680] sm:$0xf]  ;;  %v3406_v20 = vld [vmem:[#allocation2 + $0x5f0] sm:$0xf]  ;;  %v3576_v34 = vld [vmem:[#allocation2 + $0x5f4] sm:$0xf0] }
 0xb5d   : > { %2476 = vmatpush.bf16.msrb.mxu1 %v3365_v32  ;;  %v3585_v32 = vld [vmem:[#allocation2 + $0x684] sm:$0xf0] }
 0xb5e   : > { %v2143_v39 = vpack.c.bf16 %v2141_v38, %v2141_v38  ;;  %v2142_v40 = vpack.c.bf16 %v2140_v19, %v2140_v19  ;;  %v3553_v38 = vld [vmem:[#allocation2 + $0x504] sm:$0xf0]  ;;  %v3552_v19 = vld [vmem:[#allocation2 + $0x504] sm:$0xf]  ;;  %2502 = vmatpush.bf16.msra.mxu0 %v3369_v37  ;;  %v3584_v37 = vld [vmem:[#allocation2 + $0x674] sm:$0xf0] }
 0xb60   : > { %2260 = vmatmul.bf16.vlgmr.msrb.gmra.mxu2 %v2142_v40  ;;  %2286 = vmatmul.bf16.vlgmr.msrb.gmra.mxu0 %v2142_v40  ;;  %v3309_v40 = vor.u32 %v3553_v38, %v3308_v35  ;;  %v3443_v35 = vor.u32 %v3585_v32, %v3442_v33  ;;  %v3407_v38 = vor.u32 %v3576_v34, %v3406_v20 }
 0xb61   : > { %3294 = vmatmul.msk.bf16.vlgmr.msrb.gmra.mxu3 %vm608_vm7, %v2143_v39  ;;  %3295 = vmatmul.msk.bf16.vlgmr.msra.gmra.mxu1 %vm608_vm7, %v2143_v39  ;;  %v3310_v39 = vld [vmem:[#allocation2 + $0x508] sm:$0xf0] }
 0xb62   : > { %v3313_v41 = vor.u32 %v3552_v19, %v3310_v39  ;;  %2462 = vmatpush.bf16.msra.mxu3 %v3309_v40  ;;  %v3575_v39 = vld [vmem:[#allocation2 + $0x5e4] sm:$0xf0]  ;;  %v3434_v40 = vld [vmem:[#allocation2 + $0x660] sm:$0xf] }
 0xb64   : > { %2488 = vmatpush.bf16.msra.mxu2 %v3313_v41 }
 0xb66   : > { %2463 = vmatpush.bf16.msra.mxu3 %v3301_v45  ;;  %v3394_v45 = vld [vmem:[#allocation2 + $0x5c0] sm:$0xf] }
 0xb68   : > { %2489 = vmatpush.bf16.msra.mxu2 %v3305_v54  ;;  %v3395_v54 = vor.u32 %v3573_v52, %v3394_v45 }
 0xb6a   : > { %2679 = vmatpush.bf16.msrb.mxu3 %v3443_v35 }
 0xbdd   : > { %v2287_v22 = vpop.f32.mrf.mxu0 }
 0xbde   : > { %v2288_v27 = vadd.f32 %v2287_v22, %v2246_v8  ;;  %v2300_v28 = vpop.f32.mrf.mxu1 }
 0xbe0   : > { %v2301_v36 = vadd.f32 %v2300_v28, %v2288_v27 }
 0xbe2   : > { %v3297_v42 = vmul.f32 -1.442695, %v2301_v36  ;;  %v3438_v36 = vld [vmem:[#allocation2 + $0x670] sm:$0xf] }
 0xbe3   : > { %v2261_v44 = vpop.f32.mrf.mxu2  ;;  %v3439_v19 = vor.u32 %v3584_v37, %v3438_v36 }
 0xbe4   : > { %3686 = vpow2.f32 %v3297_v42  ;;  %v2262_v46 = vadd.f32 %v2261_v44, %v2245_v15  ;;  %v2274_v48 = vpop.f32.mrf.mxu3  ;;  %v3583_v42 = vld [vmem:[#allocation2 + $0x664] sm:$0xf0] }
 0xbe5   : > { %v2289_v51 = vpop.f32.mrf.mxu0  ;;  %2680 = vmatpush.bf16.msrb.mxu3 %v3439_v19  ;;  %v3435_v44 = vor.u32 %v3583_v42, %v3434_v40 }
 0xbe6   : > { %v2275_v53 = vadd.f32 %v2274_v48, %v2262_v46  ;;  %v2302_v55 = vpop.f32.mrf.mxu1  ;;  %v3398_v46 = vld [vmem:[#allocation2 + $0x5d0] sm:$0xf]  ;;  %v3574_v48 = vld [vmem:[#allocation2 + $0x5d4] sm:$0xf0]  ;;  %v3431_v51 = vor.u32 %v3582_v50, %v3430_v49  ;;  %v2567_v50 = vld [vmem:[#allocation5 + $0xf0] ss:$0 sm:$0xff] }
 0xbe7   : > { %v3399_v43 = vor.u32 %v3574_v48, %v3398_v46  ;;  %v3581_v55 = vld [vmem:[#allocation2 + $0x644] sm:$0xf0] }
 0xbe8   : > { %v3296_v56 = vmul.f32 -1.442695, %v2275_v53  ;;  %v3426_v53 = vld [vmem:[#allocation2 + $0x640] sm:$0xf] }
 0xbe9   : > { %2681 = vmatpush.bf16.msrb.mxu3 %v3435_v44 }
 0xbea   : > { %v3687_v57 = vpop.eup %3686  ;;  %3688 = vpow2.f32 %v3296_v56  ;;  %v3427_v56 = vor.u32 %v3581_v55, %v3426_v53 }
 0xbeb   : > { %v2311_v59 = vadd.f32 1.0, %v3687_v57  ;;  %v2263_v60 = vpop.f32.mrf.mxu2  ;;  %v3390_v57 = vld [vmem:[#allocation2 + $0x5b0] sm:$0xf] }
 0xbec   : > { %v2276_v61 = vpop.f32.mrf.mxu3  ;;  %v3422_v60 = vld [vmem:[#allocation2 + $0x630] sm:$0xf] }
 0xbed   : > { %3690 = vrcp.f32 %v2311_v59  ;;  %v2338_v5 = vand.u32 2147483648, %v2311_v59  ;;  %v2336_v47 = vand.u32 2147483647, %v2311_v59  ;;  %vm2332_vm5 = vweird.f32 %v2311_v59  ;;  %2682 = vmatpush.bf16.msrb.mxu3 %v3431_v51 }
 0xbef   : > { %v2339_v10 = vor.u32 1.1754944e-38, %v2338_v5  ;;  %vm2337_vm6 = vcmp.eq.f32.partialorder %v2336_v47, 8.507059e+37 }
 0xbf0   : > { %v3689_v62 = vpop.eup %3688 }
 0xbf1   : > { %v2310_v63 = vadd.f32 1.0, %v3689_v62  ;;  %2683 = vmatpush.bf16.msrb.mxu3 %v3427_v56  ;;  %v3580_v62 = vld [vmem:[#allocation2 + $0x634] sm:$0xf0] }
 0xbf3   : > { %v3691_v2 = vpop.eup %3690  ;;  %3692 = vrcp.f32 %v2310_v63  ;;  %v2323_v14 = vand.u32 2147483648, %v2310_v63  ;;  %v2321_v17 = vand.u32 2147483647, %v2310_v63  ;;  %vm2317_vm8 = vweird.f32 %v2310_v63 }
 0xbf4   : > { %v2328_v3 = vmul.f32 %v3691_v2, %v2311_v59  ;;  %vm2333_vm4 = vweird.f32 %v3691_v2  ;;  %v3572_v59 = vld [vmem:[#allocation2 + $0x5b4] sm:$0xf0] }
 0xbf5   : > { %vm2334_vm2 = vmor %vm2332_vm5, %vm2333_vm4  ;;  %v2324_v24 = vor.u32 1.1754944e-38, %v2323_v14  ;;  %vm2322_vm10 = vcmp.eq.f32.partialorder %v2321_v17, 8.507059e+37  ;;  %v3391_v61 = vor.u32 %v3572_v59, %v3390_v57 }
 0xbf6   : > { %v2329_v4 = vsub.f32 1.0, %v2328_v3  ;;  %v3571_v3 = vld [vmem:[#allocation2 + $0x5a4] sm:$0xf0] }
 0xbf8   : > { %v2330_v6 = vmul.f32 %v3691_v2, %v2329_v4  ;;  %v3418_v4 = vld [vmem:[#allocation2 + $0x620] sm:$0xf] }
 0xbf9   : > { %v3693_v7 = vpop.eup %3692 }
 0xbfa   : > { %v2331_v8 = vadd.f32 %v3691_v2, %v2330_v6  ;;  %v2313_v9 = vmul.f32 %v3693_v7, %v2310_v63  ;;  %vm2318_vm14 = vweird.f32 %v3693_v7  ;;  %v3423_v63 = vor.u32 %v3580_v62, %v3422_v60  ;;  %v3579_v6 = vld [vmem:[#allocation2 + $0x624] sm:$0xf0] }
 0xbfb   : > { %vm2319_vm9 = vmor %vm2317_vm8, %vm2318_vm14  ;;  %v3419_v47 = vor.u32 %v3579_v6, %v3418_v4 }
 0xbfc   : > { %v2335_v11 = vsel %vm2334_vm2, %v3691_v2, %v2331_v8  ;;  %v2314_v12 = vsub.f32 1.0, %v2313_v9  ;;  %2684 = vmatpush.bf16.msrb.mxu3 %v3423_v63  ;;  %v3386_v2 = vld [vmem:[#allocation2 + $0x5a0] sm:$0xf]  ;;  %v3570_v8 = vld [vmem:[#allocation2 + $0x594] sm:$0xf0] }
 0xbfd   : > { %v2340_v13 = vsel %vm2337_vm6, %v2339_v10, %v2335_v11  ;;  %v3387_v5 = vor.u32 %v3571_v3, %v3386_v2  ;;  %v3414_v9 = vld [vmem:[#allocation2 + $0x610] sm:$0xf]  ;;  %v3578_v11 = vld [vmem:[#allocation2 + $0x614] sm:$0xf0] }
 0xbfe   : > { %v2343_v15 = vperm.slane %v2340_v13, 0  ;;  %v2315_v16 = vmul.f32 %v3693_v7, %v2314_v12  ;;  %v3415_v12 = vor.u32 %v3578_v11, %v3414_v9 }
 0xc00   : > { %v2345_v22 = vmul.f32 %v2343_v15, %v4148_v21  ;;  %v2316_v23 = vadd.f32 %v3693_v7, %v2315_v16  ;;  %v3577_v21 = vld [vmem:[#allocation2 + $0x604] sm:$0xf0]  ;;  %2685 = vmatpush.bf16.msrb.mxu3 %v3419_v47  ;;  %v1781_v15 = vld [vmem:[#allocation5 + $0xe0] ss:$8 sm:$0x3] }
 0xc01   : > { %v3411_v29 = vor.u32 %v3577_v21, %v3410_v31 }
 0xc02   : > { %v2347_v25 = vpack.c.bf16 %v2345_v22, %v2345_v22  ;;  %v2320_v26 = vsel %vm2319_vm9, %v3693_v7, %v2316_v23  ;;  %v3382_v7 = vld [vmem:[#allocation2 + $0x590] sm:$0xf]  ;;  %v2349_v22 = vperm.slane %v1781_v15, 0  ;;  %v2350_v23 = vperm.slane %v1781_v15, 1 }
 0xc03   : > { %v2325_v27 = vsel %vm2322_vm10, %v2324_v24, %v2320_v26  ;;  %2666 = vmatpush.bf16.msra.mxu1 %v3411_v29  ;;  %v3383_v10 = vor.u32 %v3570_v8, %v3382_v7 }
 0xc04   : > { %3378 = vmatmul.msk.bf16.vlgmr.msrb.gmra.mxu1 %vm608_vm7, %v2347_v25  ;;  %3379 = vmatmul.msk.bf16.vlgmr.msra.gmra.mxu0 %vm608_vm7, %v2347_v25  ;;  %v2342_v28 = vperm.slane %v2325_v27, 0  ;;  %vm2532_vm7 = vcmp.lt.s32.totalorder %v263_v0, 256 }
 0xc05   : > { %2686 = vmatpush.bf16.msrb.mxu3 %v3415_v12 }
 0xc06   : > { %v2344_v58 = vmul.f32 %v2342_v28, %v4146_v18  ;;  %v3402_v18 = vld [vmem:[#allocation2 + $0x5e0] sm:$0xf] }
 0xc07   : > { %2667 = vmatpush.bf16.msra.mxu1 %v3407_v38  ;;  %v3403_v41 = vor.u32 %v3575_v39, %v3402_v18 }
 0xc08   : > { %v2346_v30 = vpack.c.bf16 %v2344_v58, %v2344_v58 }
 0xc0a   : > { %2464 = vmatmul.bf16.vlgmr.msra.gmra.mxu3 %v2346_v30  ;;  %2490 = vmatmul.bf16.vlgmr.msra.gmra.mxu2 %v2346_v30 }
 0xc0b   : > { %2668 = vmatpush.bf16.msra.mxu1 %v3403_v41 }
 0xc0f   : > { %2669 = vmatpush.bf16.msra.mxu1 %v3399_v43 }
 0xc13   : > { %2670 = vmatpush.bf16.msra.mxu1 %v3395_v54 }
 0xc17   : > { %2671 = vmatpush.bf16.msra.mxu1 %v3391_v61 }
 0xc1b   : > { %2672 = vmatpush.bf16.msra.mxu1 %v3387_v5 }
 0xc1f   : > { %2673 = vmatpush.bf16.msra.mxu1 %v3383_v10 }
 0xc81   : > { %v2478_v13 = vpop.f32.mrf.mxu1  ;;  %v2504_v14 = vpop.f32.mrf.mxu0 }
 0xc89   : > { %v2480_v16 = vpop.f32.mrf.mxu1  ;;  %v2506_v17 = vpop.f32.mrf.mxu0 }
 0xc8d   : > { %v2465_v24 = vpop.f32.mrf.mxu3  ;;  %v2491_v25 = vpop.f32.mrf.mxu2 }
 0xc8e   : > { %v2466_v26 = vadd.f32 %v2465_v24, %v2349_v22  ;;  %v2492_v27 = vadd.f32 %v2491_v25, %v2350_v23 }
 0xc90   : > { %v2479_v28 = vadd.f32 %v2478_v13, %v2466_v26  ;;  %v2505_v58 = vadd.f32 %v2504_v14, %v2492_v27 }
 0xc92   : > { %v2508_v30 = vsel %vm391_vm0, %v2479_v28, 0.0  ;;  %v2515_v31 = vsel %vm391_vm0, %v2505_v58, 0.0  ;;  %vm2527_vm0 = vcmask 1040384  }
 0xc93   : > { %v2509_v21 = vrot.slane %v2508_v30, 4  ;;  %v2516_v33 = vrot.slane %v2515_v31, 4 }
 0xc95   : > { %v2510_v29 = vadd.f32 %v2509_v21, %v2508_v30  ;;  %v2517_v32 = vadd.f32 %v2516_v33, %v2515_v31  ;;  %v2467_v20 = vpop.f32.mrf.mxu3  ;;  %v2493_v34 = vpop.f32.mrf.mxu2 }
 0xc97   : > { %v2511_v35 = vrot.slane %v2510_v29, 2  ;;  %v2518_v36 = vrot.slane %v2517_v32, 2 }
 0xc99   : > { %v2512_v37 = vadd.f32 %v2511_v35, %v2510_v29  ;;  %v2519_v38 = vadd.f32 %v2518_v36, %v2517_v32 }
 0xc9b   : > { %v2513_v19 = vrot.slane %v2512_v37, 1  ;;  %v2520_v18 = vrot.slane %v2519_v38, 1 }
 0xc9d   : > { %v2514_v39 = vadd.f32 %v2513_v19, %v2512_v37  ;;  %v2521_v40 = vadd.f32 %v2520_v18, %v2519_v38 }
 0xc9f   : > { %v2522_v41 = vmul.f32 %v2514_v39, %v4153_v1  ;;  %v2523_v42 = vmul.f32 %v2521_v40, %v4153_v1 }
 0xca1   : > { %v2526_v44 = vrot.slane %v2523_v42, 7  ;;  %v2568_v46 = vpack.c.bf16 %v2522_v41, %v2522_v41  ;;  %v2569_v48 = vpack.c.bf16 %v2523_v42, %v2523_v42 }
 0xca3   : > { %v2528_v49 = vsel %vm2527_vm0, %v2522_v41, %v2526_v44  ;;  %2674 = vmatmul.bf16.vlgmr.msra.gmra.mxu1 %v2568_v46  ;;  %2687 = vmatmul.bf16.vlgmr.msrb.gmra.mxu3 %v2569_v48 }
 0xca4   : > { %2534 = vst.msk [vmem:[%s239_s7] sm:$0x3] %vm2532_vm7, %v2528_v49 }
 0xd20   : > { %v2675_v43 = vpop.f32.mrf.mxu1 }
 0xd21   : > { %v2676_v1 = vadd.f32 %v2675_v43, %v2567_v50 }
 0xd26   : > { %v2688_v51 = vpop.f32.mrf.mxu3 }
 0xd27   : > { %v2689_v0 = vadd.f32 %v2688_v51, %v2676_v1 }
 0xd28   : > { %v2677_v45 = vpop.f32.mrf.mxu1 }
 0xd29   : > { %v2692_v52 = vmax.f32 %v2689_v0, 0.0 }
 0xd2b   : > { %2693 = vst [vmem:[%s230_s12] sm:$0x1] %v2692_v52 }
 0xd2c   : > { %3781 = shalt.err (!%p3778_p8)
}
 0xd2d   : > { %3598 = dma.vmem_to_hbm [thread:$0]  (%p3901_p5), %s2713_s13, 16, %s2715_s14, %s2699_s20  }
 0xd2e   : > { %v2690_v53 = vpop.f32.mrf.mxu3 }
 0xd2f PF: > { %p3615_p9 = scmp.ge.s32.totalorder %s3824_s18, 2  ;;  %s2733_s5 = sand.u32 1, %s3812_s15  }
 0xd30   : > { %s2734_s6 = scalar_lea.sflag [#allocation4], %s2733_s5 }
 0xd31   : > { %p3608_p10 = pnand %p3615_p9, %p3905_p6 }
 0xd33   : > { %p3609_p11 = pneg %p3608_p10 }
 0xd35   : > { %3807 = dma.done.wait (%p3609_p11), %s2734_s6, 16  }
 0xd36   : > { %3809 = vsyncadd (%p3609_p11), %s2734_s6, 4294967280  ;;  %p17_p12 = scmp.ge.s32.totalorder %s3888_s21, 4   ;;  %s4212_s15 = smov %s3816_s16 }
 0xd37   : > { %s4213_s16 = smov %s3820_s17  ;;  %s4214_s17 = smov %s3899_s24 }
 0xd38   : > { %s4215_s18 = smov %s3888_s21  ;;  %19 = sbr.rel (!%p17_p12) target bundleno = 5 (0x5), region = 91 }
 0xd3d   :  { %2739 = vsyncpa [#allocation3], 1 }
 0xd3e   :  { %2741 = vsyncpa [#allocation3 + $0x1], 1 }
 0xd3f   :  { %2742 = vsyncpa [#allocation6], 1 }
 0xd40   :  { %2743 = vsyncpa [#allocation4], 1 }
 0xd41   :  { %2745 = vsyncpa [#allocation4 + $0x1], 1 }

</bundles_post_ra>
